<compile_context>
chip_gen: v6e
topology: v6e:2x2x1
jax: 0.10.0
libtpu: 0.0.40
codegen_flags: <defaults>
</compile_context>

<pallas_src>
import jax
import jax.numpy as jnp
from jax.experimental import pallas as pl
from jax.experimental.pallas import tpu as pltpu

LANE = 128

# MXU operand dtype.  Set to jnp.bfloat16 on v6e/v7x for ~2x MXU rate and half the
# operand VMEM bytes at scale; jnp.float32 keeps exact parity with the PyTorch reference.
MXU_DTYPE = jnp.float32

VMEM_SPEC = pl.BlockSpec(memory_space=pltpu.MemorySpace.VMEM)


def _rup(n, m=LANE):
    return ((n + m - 1) // m) * m


def _mdot(a, b):
    return jnp.dot(a.astype(MXU_DTYPE), b.astype(MXU_DTYPE),
                   preferred_element_type=jnp.float32)


# ----------------------------------------------------------------------------
# Fused Pallas kernel: all STGCN layers + final Linear in one invocation.
# ----------------------------------------------------------------------------
def _make_fused_kernel(num_tc_layers, n_rows, c_pad):
    def kernel(x_ref, a_ref, mf_ref, ml_ref,
               wt_ref, bt_ref, wg_ref, bg_ref, gamma_ref, beta_ref,
               ow_ref, ob_ref, o_ref, pad_ref):
        # Zero the temporal zero-padding rows once (rows 0 and n_rows+1 stay zero).
        pad_ref[...] = jnp.zeros_like(pad_ref)

        # Hoist (N,1)->(N,C) mask broadcasts out of the (unrolled) layer loop.
        mf = jnp.broadcast_to(mf_ref[...], (n_rows, c_pad))   # zero at seq start rows
        ml = jnp.broadcast_to(ml_ref[...], (n_rows, c_pad))   # zero at seq end rows
        a = a_ref[...]
        inv_n = 1.0 / n_rows

        h = x_ref[...]
        for l in range(num_tc_layers):
            # ---- temporal Conv1d(k=3, pad=1): row shifts of flattened (B*L, C) ----
            pad_ref[pl.ds(1, n_rows), :] = h
            xm1 = pad_ref[pl.ds(0, n_rows), :] * mf            # row t-1
            xp1 = pad_ref[pl.ds(2, n_rows), :] * ml            # row t+1
            ht = (_mdot(xm1, wt_ref[l, 0])
                  + _mdot(h, wt_ref[l, 1])
                  + _mdot(xp1, wt_ref[l, 2])
                  + bt_ref[l])

            # ---- GCNConv: A_hat @ (h @ Wg) + b (sym. normalization baked into A_hat)
            g = _mdot(a, _mdot(ht, wg_ref[l])) + bg_ref[l]

            # ---- BatchNorm1d (training-mode batch stats, single pass) + ReLU ----
            mean = jnp.sum(g, axis=0, keepdims=True) * inv_n
            msq = jnp.sum(g * g, axis=0, keepdims=True) * inv_n
            var = msq - mean * mean                            # biased variance
            inv = jax.lax.rsqrt(var + 1e-5)
            scale = gamma_ref[l] * inv
            shift = beta_ref[l] - mean * scale
            h = jnp.maximum(g * scale + shift, 0.0)

        # ---- final Linear (lane-dense (N, 128) output; sliced outside) ----
        o_ref[...] = _mdot(h, ow_ref[...]) + ob_ref[...]

    return kernel


# ----------------------------------------------------------------------------
# Wrapper
# ----------------------------------------------------------------------------
def stgcn_forward(x, a_hat, params):
    """x: (B, L, Cin) f32 -> (B, L, out_channels) f32."""
    B, L, Cin = x.shape
    N = B * L
    NL = params["wt"].shape[0]
    CP = params["wt"].shape[2]            # padded channel width (multiple of 128)
    CO = params["out_channels"]

    # Lane-pad the input channels once (pure layout glue).
    x_pad = jnp.zeros((N, CP), jnp.float32).at[:, :Cin].set(x.reshape(N, Cin))

    # Per-row masks zeroing the temporal shift at sequence boundaries of each batch.
    t = jnp.arange(N, dtype=jnp.int32) % L
    mask_first = (t != 0).astype(jnp.float32)[:, None]        # (N, 1)
    mask_last = (t != L - 1).astype(jnp.float32)[:, None]     # (N, 1)

    kernel = _make_fused_kernel(NL, N, CP)
    out = pl.pallas_call(
        kernel,
        out_shape=jax.ShapeDtypeStruct((N, CP), jnp.float32),
        in_specs=[VMEM_SPEC] * 12,
        out_specs=VMEM_SPEC,
        scratch_shapes=[pltpu.VMEM((N + 2, CP), jnp.float32)],  # temporal pad buffer
    )(x_pad, a_hat, mask_first, mask_last,
      params["wt"], params["bt"], params["wg"], params["bg"],
      params["gamma"], params["beta"], params["out_w"], params["out_b"])

    return out[:, :CO].reshape(B, L, CO)


# ----------------------------------------------------------------------------
# Parameter / graph construction (deterministic glue)
# ----------------------------------------------------------------------------
def make_params(key, in_channels, hidden_channels, out_channels, num_layers, c_pad):
    nl = num_layers - 1                    # input layer + (num_layers - 2) hidden layers
    keys = jax.random.split(key, nl + 1)

    wt = jnp.zeros((nl, 3, c_pad, c_pad), jnp.float32)
    bt = jnp.zeros((nl, 1, c_pad), jnp.float32)
    wg = jnp.zeros((nl, c_pad, c_pad), jnp.float32)
    bg = jnp.zeros((nl, 1, c_pad), jnp.float32)
    gamma = jnp.zeros((nl, 1, c_pad), jnp.float32)
    beta = jnp.zeros((nl, 1, c_pad), jnp.float32)

    cin = in_channels
    for l in range(nl):
        k1, k2, k3, k4 = jax.random.split(keys[l], 4)
        # torch Conv1d weight (Cout, Cin, 3) -> 3 matrices of shape (Cin, Cout)
        wt_t = 0.1 * jax.random.normal(k1, (hidden_channels, cin, 3), jnp.float32)
        wt = wt.at[l, :, :cin, :hidden_channels].set(jnp.transpose(wt_t, (2, 1, 0)))
        bt = bt.at[l, 0, :hidden_channels].set(
            0.1 * jax.random.normal(k2, (hidden_channels,), jnp.float32))
        # GCNConv linear (hidden -> hidden), applied as h @ wg
        wg = wg.at[l, :hidden_channels, :hidden_channels].set(
            0.1 * jax.random.normal(k3, (hidden_channels, hidden_channels), jnp.float32))
        bg = bg.at[l, 0, :hidden_channels].set(
            0.1 * jax.random.normal(k4, (hidden_channels,), jnp.float32))
        gamma = gamma.at[l, 0, :hidden_channels].set(1.0)      # BatchNorm default init
        cin = hidden_channels

    # Final Linear(hidden, out): torch weight (out, hidden) -> (hidden, out)
    kw1, kw2 = jax.random.split(keys[-1])
    ow = jnp.zeros((c_pad, c_pad), jnp.float32)
    ow = ow.at[:hidden_channels, :out_channels].set(
        (0.1 * jax.random.normal(kw1, (out_channels, hidden_channels), jnp.float32)).T)
    ob = jnp.zeros((1, c_pad), jnp.float32)
    ob = ob.at[0, :out_channels].set(
        0.1 * jax.random.normal(kw2, (out_channels,), jnp.float32))

    return {"wt": wt, "bt": bt, "wg": wg, "bg": bg, "gamma": gamma, "beta": beta,
            "out_w": ow, "out_b": ob, "out_channels": out_channels}


def build_norm_adj(edge_index, edge_weight, n):
    """Dense symmetrically-normalized adjacency with self loops (GCNConv gcn_norm)."""
    # Scatter-based sparse aggregation kept in JAX glue; kernel consumes dense A_hat.
    src, dst = edge_index[0], edge_index[1]
    A = jnp.zeros((n, n), jnp.float32).at[dst, src].add(edge_weight)
    A = A + jnp.eye(n, dtype=jnp.float32)          # self loops, weight 1.0
    deg = jnp.sum(A, axis=1)
    dinv = jnp.where(deg > 0, jax.lax.rsqrt(deg), 0.0)
    return dinv[:, None] * A * dinv[None, :]


# ----------------------------------------------------------------------------
if __name__ == "__main__":
    # Model config (matches STGCN(num_nodes, in_channels, hidden, out, num_layers=3))
    B, L = 2, 16
    in_channels, hidden_channels, out_channels = 4, 32, 8
    num_layers = 3
    N = B * L                                      # GCN nodes = batch * seq (reshape(-1, C))
    CP = _rup(max(in_channels, hidden_channels, out_channels))   # lane-dense channel pad

    key = jax.random.PRNGKey(0)
    kx, kw, ke = jax.random.split(key, 3)

    # Input x: (batch, seq_len, in_channels)
    x = jax.random.normal(kx, (B, L, in_channels), jnp.float32)

    # Deterministic graph over the N flattened nodes: bidirectional ring, positive weights.
    idx = jnp.arange(N, dtype=jnp.int32)
    src = jnp.concatenate([idx, (idx + 1) % N])
    dst = jnp.concatenate([(idx + 1) % N, idx])
    edge_index = jnp.stack([src, dst])             # (2, 2N)
    edge_weight = jax.random.uniform(ke, (2 * N,), jnp.float32, 0.5, 1.5)
    a_hat = build_norm_adj(edge_index, edge_weight, N)

    params = make_params(kw, in_channels, hidden_channels, out_channels, num_layers, CP)

    y = stgcn_forward(x, a_hat, params)
    jax.block_until_ready(y)
    assert y.shape == (B, L, out_channels)
    print("KERNEL_OK")
</pallas_src>

<mosaic_0001>
module attributes {stable_mosaic.version = 11 : i64} {
  func.func @kernel(%arg0: memref<32x128xf32, #tpu.memory_space<vmem>>, %arg1: memref<32x32xf32, #tpu.memory_space<vmem>>, %arg2: memref<32x1xf32, #tpu.memory_space<vmem>>, %arg3: memref<32x1xf32, #tpu.memory_space<vmem>>, %arg4: memref<2x3x128x128xf32, #tpu.memory_space<vmem>>, %arg5: memref<2x1x128xf32, #tpu.memory_space<vmem>>, %arg6: memref<2x128x128xf32, #tpu.memory_space<vmem>>, %arg7: memref<2x1x128xf32, #tpu.memory_space<vmem>>, %arg8: memref<2x1x128xf32, #tpu.memory_space<vmem>>, %arg9: memref<2x1x128xf32, #tpu.memory_space<vmem>>, %arg10: memref<128x128xf32, #tpu.memory_space<vmem>>, %arg11: memref<1x128xf32, #tpu.memory_space<vmem>>, %arg12: memref<32x128xf32, #tpu.memory_space<vmem>>, %arg13: memref<34x128xf32, #tpu.memory_space<vmem>>) attributes {dimension_semantics = [], scalar_prefetch = 0 : i64, scratch_operands = 1 : i64, tpu.core_type = #tpu.core_type<tc>} {
    %cst = arith.constant 0.000000e+00 : f32
    %0 = vector.broadcast %cst : f32 to vector<34x128xf32>
    %c0 = arith.constant 0 : index
    %c0_0 = arith.constant 0 : index
    %1 = vector.load %arg13[%c0, %c0_0] : memref<34x128xf32, #tpu.memory_space<vmem>>, vector<34x128xf32>
    tpu.vector_store %arg13[%c0, %c0_0], %0 {strides = array<i32>} : memref<34x128xf32, #tpu.memory_space<vmem>>, vector<34x128xf32>,
    %c0_1 = arith.constant 0 : index
    %c0_2 = arith.constant 0 : index
    %2 = vector.load %arg2[%c0_1, %c0_2] : memref<32x1xf32, #tpu.memory_space<vmem>>, vector<32x1xf32>
    %3 = vector.shape_cast %2 : vector<32x1xf32> to vector<32x1xf32>
    %4 = vector.broadcast %3 : vector<32x1xf32> to vector<32x128xf32>
    %c0_3 = arith.constant 0 : index
    %c0_4 = arith.constant 0 : index
    %5 = vector.load %arg3[%c0_3, %c0_4] : memref<32x1xf32, #tpu.memory_space<vmem>>, vector<32x1xf32>
    %6 = vector.shape_cast %5 : vector<32x1xf32> to vector<32x1xf32>
    %7 = vector.broadcast %6 : vector<32x1xf32> to vector<32x128xf32>
    %c0_5 = arith.constant 0 : index
    %c0_6 = arith.constant 0 : index
    %8 = vector.load %arg1[%c0_5, %c0_6] : memref<32x32xf32, #tpu.memory_space<vmem>>, vector<32x32xf32>
    %c0_7 = arith.constant 0 : index
    %c0_8 = arith.constant 0 : index
    %9 = vector.load %arg0[%c0_7, %c0_8] : memref<32x128xf32, #tpu.memory_space<vmem>>, vector<32x128xf32>
    %c1 = arith.constant 1 : index
    %c0_9 = arith.constant 0 : index
    %10 = vector.load %arg13[%c1, %c0_9] : memref<34x128xf32, #tpu.memory_space<vmem>>, vector<32x128xf32>
    tpu.vector_store %arg13[%c1, %c0_9], %9 {strides = array<i32>} : memref<34x128xf32, #tpu.memory_space<vmem>>, vector<32x128xf32>,
    %c0_10 = arith.constant 0 : index
    %c0_11 = arith.constant 0 : index
    %11 = vector.load %arg13[%c0_10, %c0_11] : memref<34x128xf32, #tpu.memory_space<vmem>>, vector<32x128xf32>
    %12 = arith.mulf %11, %4 : vector<32x128xf32>
    %c2 = arith.constant 2 : index
    %c0_12 = arith.constant 0 : index
    %13 = vector.load %arg13[%c2, %c0_12] : memref<34x128xf32, #tpu.memory_space<vmem>>, vector<32x128xf32>
    %14 = arith.mulf %13, %7 : vector<32x128xf32>
    %c0_13 = arith.constant 0 : index
    %c0_14 = arith.constant 0 : index
    %c0_15 = arith.constant 0 : index
    %c0_16 = arith.constant 0 : index
    %15 = vector.load %arg4[%c0_13, %c0_14, %c0_15, %c0_16] : memref<2x3x128x128xf32, #tpu.memory_space<vmem>>, vector<1x1x128x128xf32>
    %16 = vector.shape_cast %15 : vector<1x1x128x128xf32> to vector<128x128xf32>
    %cst_17 = arith.constant dense<0.000000e+00> : vector<32x128xf32>
    %17 = tpu.matmul %12, %16, %cst_17 {dimension_numbers = #tpu.dot_dimension_numbers<[1], [0], [0], [1], [0, 0, 1, 1], [], []>} : vector<32x128xf32>, vector<128x128xf32>, vector<32x128xf32> -> vector<32x128xf32>
    %c0_18 = arith.constant 0 : index
    %c1_19 = arith.constant 1 : index
    %c0_20 = arith.constant 0 : index
    %c0_21 = arith.constant 0 : index
    %18 = vector.load %arg4[%c0_18, %c1_19, %c0_20, %c0_21] : memref<2x3x128x128xf32, #tpu.memory_space<vmem>>, vector<1x1x128x128xf32>
    %19 = vector.shape_cast %18 : vector<1x1x128x128xf32> to vector<128x128xf32>
    %cst_22 = arith.constant dense<0.000000e+00> : vector<32x128xf32>
    %20 = tpu.matmul %9, %19, %cst_22 {dimension_numbers = #tpu.dot_dimension_numbers<[1], [0], [0], [1], [0, 0, 1, 1], [], []>} : vector<32x128xf32>, vector<128x128xf32>, vector<32x128xf32> -> vector<32x128xf32>
    %21 = arith.addf %17, %20 : vector<32x128xf32>
    %c0_23 = arith.constant 0 : index
    %c2_24 = arith.constant 2 : index
    %c0_25 = arith.constant 0 : index
    %c0_26 = arith.constant 0 : index
    %22 = vector.load %arg4[%c0_23, %c2_24, %c0_25, %c0_26] : memref<2x3x128x128xf32, #tpu.memory_space<vmem>>, vector<1x1x128x128xf32>
    %23 = vector.shape_cast %22 : vector<1x1x128x128xf32> to vector<128x128xf32>
    %cst_27 = arith.constant dense<0.000000e+00> : vector<32x128xf32>
    %24 = tpu.matmul %14, %23, %cst_27 {dimension_numbers = #tpu.dot_dimension_numbers<[1], [0], [0], [1], [0, 0, 1, 1], [], []>} : vector<32x128xf32>, vector<128x128xf32>, vector<32x128xf32> -> vector<32x128xf32>
    %25 = arith.addf %21, %24 : vector<32x128xf32>
    %c0_28 = arith.constant 0 : index
    %c0_29 = arith.constant 0 : index
    %c0_30 = arith.constant 0 : index
    %26 = vector.load %arg5[%c0_28, %c0_29, %c0_30] : memref<2x1x128xf32, #tpu.memory_space<vmem>>, vector<1x1x128xf32>
    %27 = vector.shape_cast %26 : vector<1x1x128xf32> to vector<1x128xf32>
    %28 = vector.broadcast %27 : vector<1x128xf32> to vector<32x128xf32>
    %29 = arith.addf %25, %28 : vector<32x128xf32>
    %c0_31 = arith.constant 0 : index
    %c0_32 = arith.constant 0 : index
    %c0_33 = arith.constant 0 : index
    %30 = vector.load %arg6[%c0_31, %c0_32, %c0_33] : memref<2x128x128xf32, #tpu.memory_space<vmem>>, vector<1x128x128xf32>
    %31 = vector.shape_cast %30 : vector<1x128x128xf32> to vector<128x128xf32>
    %cst_34 = arith.constant dense<0.000000e+00> : vector<32x128xf32>
    %32 = tpu.matmul %29, %31, %cst_34 {dimension_numbers = #tpu.dot_dimension_numbers<[1], [0], [0], [1], [0, 0, 1, 1], [], []>} : vector<32x128xf32>, vector<128x128xf32>, vector<32x128xf32> -> vector<32x128xf32>
    %cst_35 = arith.constant dense<0.000000e+00> : vector<32x128xf32>
    %33 = tpu.matmul %8, %32, %cst_35 {dimension_numbers = #tpu.dot_dimension_numbers<[1], [0], [0], [1], [0, 0, 1, 1], [], []>} : vector<32x32xf32>, vector<32x128xf32>, vector<32x128xf32> -> vector<32x128xf32>
    %c0_36 = arith.constant 0 : index
    %c0_37 = arith.constant 0 : index
    %c0_38 = arith.constant 0 : index
    %34 = vector.load %arg7[%c0_36, %c0_37, %c0_38] : memref<2x1x128xf32, #tpu.memory_space<vmem>>, vector<1x1x128xf32>
    %35 = vector.shape_cast %34 : vector<1x1x128xf32> to vector<1x128xf32>
    %36 = vector.broadcast %35 : vector<1x128xf32> to vector<32x128xf32>
    %37 = arith.addf %33, %36 : vector<32x128xf32>
    %cst_39 = arith.constant dense<0.000000e+00> : vector<128xf32>
    %38 = vector.multi_reduction <add>, %37, %cst_39 [0] : vector<32x128xf32> to vector<128xf32>
    %39 = vector.shape_cast %38 : vector<128xf32> to vector<1x128xf32>
    %cst_40 = arith.constant 3.125000e-02 : f32
    %40 = vector.broadcast %cst_40 : f32 to vector<1x128xf32>
    %41 = arith.mulf %39, %40 : vector<1x128xf32>
    %42 = arith.mulf %37, %37 : vector<32x128xf32>
    %cst_41 = arith.constant dense<0.000000e+00> : vector<128xf32>
    %43 = vector.multi_reduction <add>, %42, %cst_41 [0] : vector<32x128xf32> to vector<128xf32>
    %44 = vector.shape_cast %43 : vector<128xf32> to vector<1x128xf32>
    %cst_42 = arith.constant 3.125000e-02 : f32
    %45 = vector.broadcast %cst_42 : f32 to vector<1x128xf32>
    %46 = arith.mulf %44, %45 : vector<1x128xf32>
    %47 = arith.mulf %41, %41 : vector<1x128xf32>
    %48 = arith.subf %46, %47 : vector<1x128xf32>
    %cst_43 = arith.constant 9.99999974E-6 : f32
    %49 = vector.broadcast %cst_43 : f32 to vector<1x128xf32>
    %50 = arith.addf %48, %49 : vector<1x128xf32>
    %51 = math.rsqrt %50 : vector<1x128xf32>
    %c0_44 = arith.constant 0 : index
    %c0_45 = arith.constant 0 : index
    %c0_46 = arith.constant 0 : index
    %52 = vector.load %arg8[%c0_44, %c0_45, %c0_46] : memref<2x1x128xf32, #tpu.memory_space<vmem>>, vector<1x1x128xf32>
    %53 = vector.shape_cast %52 : vector<1x1x128xf32> to vector<1x128xf32>
    %54 = arith.mulf %53, %51 : vector<1x128xf32>
    %c0_47 = arith.constant 0 : index
    %c0_48 = arith.constant 0 : index
    %c0_49 = arith.constant 0 : index
    %55 = vector.load %arg9[%c0_47, %c0_48, %c0_49] : memref<2x1x128xf32, #tpu.memory_space<vmem>>, vector<1x1x128xf32>
    %56 = vector.shape_cast %55 : vector<1x1x128xf32> to vector<1x128xf32>
    %57 = arith.mulf %41, %54 : vector<1x128xf32>
    %58 = arith.subf %56, %57 : vector<1x128xf32>
    %59 = vector.broadcast %54 : vector<1x128xf32> to vector<32x128xf32>
    %60 = arith.mulf %37, %59 : vector<32x128xf32>
    %61 = vector.broadcast %58 : vector<1x128xf32> to vector<32x128xf32>
    %62 = arith.addf %60, %61 : vector<32x128xf32>
    %cst_50 = arith.constant 0.000000e+00 : f32
    %63 = vector.broadcast %cst_50 : f32 to vector<32x128xf32>
    %64 = arith.maximumf %62, %63 : vector<32x128xf32>
    %c1_51 = arith.constant 1 : index
    %c0_52 = arith.constant 0 : index
    %65 = vector.load %arg13[%c1_51, %c0_52] : memref<34x128xf32, #tpu.memory_space<vmem>>, vector<32x128xf32>
    tpu.vector_store %arg13[%c1_51, %c0_52], %64 {strides = array<i32>} : memref<34x128xf32, #tpu.memory_space<vmem>>, vector<32x128xf32>,
    %c0_53 = arith.constant 0 : index
    %c0_54 = arith.constant 0 : index
    %66 = vector.load %arg13[%c0_53, %c0_54] : memref<34x128xf32, #tpu.memory_space<vmem>>, vector<32x128xf32>
    %67 = arith.mulf %66, %4 : vector<32x128xf32>
    %c2_55 = arith.constant 2 : index
    %c0_56 = arith.constant 0 : index
    %68 = vector.load %arg13[%c2_55, %c0_56] : memref<34x128xf32, #tpu.memory_space<vmem>>, vector<32x128xf32>
    %69 = arith.mulf %68, %7 : vector<32x128xf32>
    %c1_57 = arith.constant 1 : index
    %c0_58 = arith.constant 0 : index
    %c0_59 = arith.constant 0 : index
    %c0_60 = arith.constant 0 : index
    %70 = vector.load %arg4[%c1_57, %c0_58, %c0_59, %c0_60] : memref<2x3x128x128xf32, #tpu.memory_space<vmem>>, vector<1x1x128x128xf32>
    %71 = vector.shape_cast %70 : vector<1x1x128x128xf32> to vector<128x128xf32>
    %cst_61 = arith.constant dense<0.000000e+00> : vector<32x128xf32>
    %72 = tpu.matmul %67, %71, %cst_61 {dimension_numbers = #tpu.dot_dimension_numbers<[1], [0], [0], [1], [0, 0, 1, 1], [], []>} : vector<32x128xf32>, vector<128x128xf32>, vector<32x128xf32> -> vector<32x128xf32>
    %c1_62 = arith.constant 1 : index
    %c1_63 = arith.constant 1 : index
    %c0_64 = arith.constant 0 : index
    %c0_65 = arith.constant 0 : index
    %73 = vector.load %arg4[%c1_62, %c1_63, %c0_64, %c0_65] : memref<2x3x128x128xf32, #tpu.memory_space<vmem>>, vector<1x1x128x128xf32>
    %74 = vector.shape_cast %73 : vector<1x1x128x128xf32> to vector<128x128xf32>
    %cst_66 = arith.constant dense<0.000000e+00> : vector<32x128xf32>
    %75 = tpu.matmul %64, %74, %cst_66 {dimension_numbers = #tpu.dot_dimension_numbers<[1], [0], [0], [1], [0, 0, 1, 1], [], []>} : vector<32x128xf32>, vector<128x128xf32>, vector<32x128xf32> -> vector<32x128xf32>
    %76 = arith.addf %72, %75 : vector<32x128xf32>
    %c1_67 = arith.constant 1 : index
    %c2_68 = arith.constant 2 : index
    %c0_69 = arith.constant 0 : index
    %c0_70 = arith.constant 0 : index
    %77 = vector.load %arg4[%c1_67, %c2_68, %c0_69, %c0_70] : memref<2x3x128x128xf32, #tpu.memory_space<vmem>>, vector<1x1x128x128xf32>
    %78 = vector.shape_cast %77 : vector<1x1x128x128xf32> to vector<128x128xf32>
    %cst_71 = arith.constant dense<0.000000e+00> : vector<32x128xf32>
    %79 = tpu.matmul %69, %78, %cst_71 {dimension_numbers = #tpu.dot_dimension_numbers<[1], [0], [0], [1], [0, 0, 1, 1], [], []>} : vector<32x128xf32>, vector<128x128xf32>, vector<32x128xf32> -> vector<32x128xf32>
    %80 = arith.addf %76, %79 : vector<32x128xf32>
    %c1_72 = arith.constant 1 : index
    %c0_73 = arith.constant 0 : index
    %c0_74 = arith.constant 0 : index
    %81 = vector.load %arg5[%c1_72, %c0_73, %c0_74] : memref<2x1x128xf32, #tpu.memory_space<vmem>>, vector<1x1x128xf32>
    %82 = vector.shape_cast %81 : vector<1x1x128xf32> to vector<1x128xf32>
    %83 = vector.broadcast %82 : vector<1x128xf32> to vector<32x128xf32>
    %84 = arith.addf %80, %83 : vector<32x128xf32>
    %c1_75 = arith.constant 1 : index
    %c0_76 = arith.constant 0 : index
    %c0_77 = arith.constant 0 : index
    %85 = vector.load %arg6[%c1_75, %c0_76, %c0_77] : memref<2x128x128xf32, #tpu.memory_space<vmem>>, vector<1x128x128xf32>
    %86 = vector.shape_cast %85 : vector<1x128x128xf32> to vector<128x128xf32>
    %cst_78 = arith.constant dense<0.000000e+00> : vector<32x128xf32>
    %87 = tpu.matmul %84, %86, %cst_78 {dimension_numbers = #tpu.dot_dimension_numbers<[1], [0], [0], [1], [0, 0, 1, 1], [], []>} : vector<32x128xf32>, vector<128x128xf32>, vector<32x128xf32> -> vector<32x128xf32>
    %cst_79 = arith.constant dense<0.000000e+00> : vector<32x128xf32>
    %88 = tpu.matmul %8, %87, %cst_79 {dimension_numbers = #tpu.dot_dimension_numbers<[1], [0], [0], [1], [0, 0, 1, 1], [], []>} : vector<32x32xf32>, vector<32x128xf32>, vector<32x128xf32> -> vector<32x128xf32>
    %c1_80 = arith.constant 1 : index
    %c0_81 = arith.constant 0 : index
    %c0_82 = arith.constant 0 : index
    %89 = vector.load %arg7[%c1_80, %c0_81, %c0_82] : memref<2x1x128xf32, #tpu.memory_space<vmem>>, vector<1x1x128xf32>
    %90 = vector.shape_cast %89 : vector<1x1x128xf32> to vector<1x128xf32>
    %91 = vector.broadcast %90 : vector<1x128xf32> to vector<32x128xf32>
    %92 = arith.addf %88, %91 : vector<32x128xf32>
    %cst_83 = arith.constant dense<0.000000e+00> : vector<128xf32>
    %93 = vector.multi_reduction <add>, %92, %cst_83 [0] : vector<32x128xf32> to vector<128xf32>
    %94 = vector.shape_cast %93 : vector<128xf32> to vector<1x128xf32>
    %cst_84 = arith.constant 3.125000e-02 : f32
    %95 = vector.broadcast %cst_84 : f32 to vector<1x128xf32>
    %96 = arith.mulf %94, %95 : vector<1x128xf32>
    %97 = arith.mulf %92, %92 : vector<32x128xf32>
    %cst_85 = arith.constant dense<0.000000e+00> : vector<128xf32>
    %98 = vector.multi_reduction <add>, %97, %cst_85 [0] : vector<32x128xf32> to vector<128xf32>
    %99 = vector.shape_cast %98 : vector<128xf32> to vector<1x128xf32>
    %cst_86 = arith.constant 3.125000e-02 : f32
    %100 = vector.broadcast %cst_86 : f32 to vector<1x128xf32>
    %101 = arith.mulf %99, %100 : vector<1x128xf32>
    %102 = arith.mulf %96, %96 : vector<1x128xf32>
    %103 = arith.subf %101, %102 : vector<1x128xf32>
    %cst_87 = arith.constant 9.99999974E-6 : f32
    %104 = vector.broadcast %cst_87 : f32 to vector<1x128xf32>
    %105 = arith.addf %103, %104 : vector<1x128xf32>
    %106 = math.rsqrt %105 : vector<1x128xf32>
    %c1_88 = arith.constant 1 : index
    %c0_89 = arith.constant 0 : index
    %c0_90 = arith.constant 0 : index
    %107 = vector.load %arg8[%c1_88, %c0_89, %c0_90] : memref<2x1x128xf32, #tpu.memory_space<vmem>>, vector<1x1x128xf32>
    %108 = vector.shape_cast %107 : vector<1x1x128xf32> to vector<1x128xf32>
    %109 = arith.mulf %108, %106 : vector<1x128xf32>
    %c1_91 = arith.constant 1 : index
    %c0_92 = arith.constant 0 : index
    %c0_93 = arith.constant 0 : index
    %110 = vector.load %arg9[%c1_91, %c0_92, %c0_93] : memref<2x1x128xf32, #tpu.memory_space<vmem>>, vector<1x1x128xf32>
    %111 = vector.shape_cast %110 : vector<1x1x128xf32> to vector<1x128xf32>
    %112 = arith.mulf %96, %109 : vector<1x128xf32>
    %113 = arith.subf %111, %112 : vector<1x128xf32>
    %114 = vector.broadcast %109 : vector<1x128xf32> to vector<32x128xf32>
    %115 = arith.mulf %92, %114 : vector<32x128xf32>
    %116 = vector.broadcast %113 : vector<1x128xf32> to vector<32x128xf32>
    %117 = arith.addf %115, %116 : vector<32x128xf32>
    %cst_94 = arith.constant 0.000000e+00 : f32
    %118 = vector.broadcast %cst_94 : f32 to vector<32x128xf32>
    %119 = arith.maximumf %117, %118 : vector<32x128xf32>
    %c0_95 = arith.constant 0 : index
    %c0_96 = arith.constant 0 : index
    %120 = vector.load %arg10[%c0_95, %c0_96] : memref<128x128xf32, #tpu.memory_space<vmem>>, vector<128x128xf32>
    %cst_97 = arith.constant dense<0.000000e+00> : vector<32x128xf32>
    %121 = tpu.matmul %119, %120, %cst_97 {dimension_numbers = #tpu.dot_dimension_numbers<[1], [0], [0], [1], [0, 0, 1, 1], [], []>} : vector<32x128xf32>, vector<128x128xf32>, vector<32x128xf32> -> vector<32x128xf32>
    %c0_98 = arith.constant 0 : index
    %c0_99 = arith.constant 0 : index
    %122 = vector.load %arg11[%c0_98, %c0_99] : memref<1x128xf32, #tpu.memory_space<vmem>>, vector<1x128xf32>
    %123 = vector.broadcast %122 : vector<1x128xf32> to vector<32x128xf32>
    %124 = arith.addf %121, %123 : vector<32x128xf32>
    %c0_100 = arith.constant 0 : index
    %c0_101 = arith.constant 0 : index
    %125 = vector.load %arg12[%c0_100, %c0_101] : memref<32x128xf32, #tpu.memory_space<vmem>>, vector<32x128xf32>
    tpu.vector_store %arg12[%c0_100, %c0_101], %124 {strides = array<i32>} : memref<32x128xf32, #tpu.memory_space<vmem>>, vector<32x128xf32>,
    return
  }
}

</mosaic_0001>

<bundles_post_ra>
// kernel: tpu_custom_call.1
= control target key start
LH: loop header
LB: loop body
LE: loop exit
PB: predicated region body
PF: predicated region fallthrough
CT: control target
= control target key end

     0   :  { %17 = vsyncpa [#allocation4], 0  ;;  %s2406_s0 = inlined_call_operand.vmem [shape: f32[32,128], index: 0, kind: input, shape index: {}]   ;;  %s2407_s1 = inlined_call_operand.vmem [shape: f32[32,32], index: 1, kind: input, shape index: {}]   ;;  %s2408_s2 = inlined_call_operand.vmem [shape: f32[32,1], index: 2, kind: input, shape index: {}]   ;;  %s2409_s3 = inlined_call_operand.vmem [shape: f32[32,1], index: 3, kind: input, shape index: {}]   ;;  %s2410_s4 = inlined_call_operand.hbm [shape: f32[2,3,128,128], index: 4, kind: input, shape index: {}]   ;;  %s2411_s5 = inlined_call_operand.vmem [shape: f32[2,1,128], index: 5, kind: input, shape index: {}]   ;;  %s2412_s6 = inlined_call_operand.hbm [shape: f32[2,128,128], index: 6, kind: input, shape index: {}]   ;;  %s2413_s7 = inlined_call_operand.vmem [shape: f32[2,1,128], index: 7, kind: input, shape index: {}]   ;;  %s2414_s8 = inlined_call_operand.vmem [shape: f32[2,1,128], index: 8, kind: input, shape index: {}]   ;;  %s2415_s9 = inlined_call_operand.vmem [shape: f32[2,1,128], index: 9, kind: input, shape index: {}]   ;;  %s2416_s10 = inlined_call_operand.hbm [shape: f32[128,128], index: 10, kind: input, shape index: {}]   ;;  %s2417_s11 = inlined_call_operand.vmem [shape: f32[1,128], index: 11, kind: input, shape index: {}]   ;;  %s2418_s12 = inlined_call_operand.hbm [shape: f32[32,128], index: 12, kind: output, shape index: {}]  }
   0x1   :  { %18 = vsyncpa [#allocation7], 0 }
   0x2   :  { %19 = vsyncpa [#allocation5], 0  ;;  %s2156_s21 = smov [#allocation6]   ;;  %s2157_s23 = smov [#allocation3]  }
   0x3   :  { %s47_s22 = sshll.u32 %s2156_s21, 4  ;;  %s33_s24 = sshll.u32 %s2157_s23, 4  ;;  %s48_s22 = int_to_ptr.vmem [resolvable:$true] %s47_s22  ;;  %s34_s24 = int_to_ptr.vmem [resolvable:$true] %s33_s24 }
   0x4   :  { %s2078_s25 = scalar_lea.vmem %s48_s22, 4096  ;;  %p2083_p1 = scmp.lt.s32.totalorder %s48_s22, %s48_s22 }
   0x5   :  { %p2079_p0 = scmp.ne.s32.totalorder %s48_s22, %s2078_s25  ;;  %p2084_p2 = scmp.lt.s32.totalorder %s2078_s25, %s2078_s25 }
   0x7   :  { %p2085_p3 = por %p2084_p2, %p2083_p1 }
   0x9   :  { %p2086_p4 = pnand %p2085_p3, %p2079_p0 }
   0xb   :  { %2089 = shalt.err (!%p2086_p4)
}
   0xc   :  { %s2158_s26 = smov 128   ;;  %s2159_s27 = smov 8  }
   0xd   :  { %53 = dma.hbm_to_vmem [thread:$0]  %s2412_s6, 4096, %s48_s22, [#allocation7], %s2158_s26, %s2158_s26, %s2159_s27  }
   0xe   :  { %s2098_s30 = scalar_lea.vmem %s34_s24, 12288  ;;  %p2103_p6 = scmp.lt.s32.totalorder %s34_s24, %s34_s24 }
   0xf   :  { %p2099_p5 = scmp.ne.s32.totalorder %s34_s24, %s2098_s30  ;;  %p2104_p7 = scmp.lt.s32.totalorder %s2098_s30, %s2098_s30 }
  0x11   :  { %p2105_p8 = por %p2104_p7, %p2103_p6 }
  0x13   :  { %p2106_p9 = pnand %p2105_p8, %p2099_p5 }
  0x15   :  { %2109 = shalt.err (!%p2106_p9)
}
  0x16   :  { %39 = dma.hbm_to_vmem [thread:$0]  %s2410_s4, 12288, %s34_s24, [#allocation4], %s2158_s26, %s2158_s26, %s2159_s27  }
  0x17   :  { %s2160_s15 = smov [#allocation8]  }
  0x18   :  { %s65_s16 = sshll.u32 %s2160_s15, 4  ;;  %s66_s16 = int_to_ptr.vmem [resolvable:$true] %s65_s16 }
  0x19   :  { %s2118_s17 = scalar_lea.vmem %s66_s16, 2048  ;;  %p2123_p11 = scmp.lt.s32.totalorder %s66_s16, %s66_s16 }
  0x1a   :  { %p2119_p10 = scmp.ne.s32.totalorder %s66_s16, %s2118_s17  ;;  %p2124_p12 = scmp.lt.s32.totalorder %s2118_s17, %s2118_s17 }
  0x1c   :  { %p2125_p13 = por %p2124_p12, %p2123_p11 }
  0x1e   :  { %p2126_p0 = pnand %p2125_p13, %p2119_p10 }
  0x20   :  { %2129 = shalt.err (!%p2126_p0)
}
  0x21   :  { %71 = dma.hbm_to_vmem [thread:$0]  %s2416_s10, 2048, %s66_s16, [#allocation7], %s2158_s26, %s2158_s26, %s2159_s27  }
  0x22   :  { %2150 = dma.done.wait [#allocation4], 12288  }
  0x23   :  { %2151 = vsyncadd [#allocation4], 4294955008 }
  0x24   :  { %2152 = dma.done.wait [#allocation7], 6144  }
  0x25   :  { %2153 = vsyncadd [#allocation7], 4294961152  ;;  %v2161_v0 = vmov 0   ;;  %v2162_v1 = vmov 0.0   ;;  %v112_v2 = vld [vmem:[%s2409_s3] sm:$0xff]  ;;  %v113_v4 = vld [vmem:[%s2409_s3 + $0x8] sm:$0xff] }
  0x26   :  { %2065 = vset.pattern.permute.xlu1 %v2161_v0  ;;  %2064 = vset.pattern.permute.xlu0 %v2161_v0  ;;  %83 = vst [vmem:[#allocation2] sm:$0xff] %v2162_v1  ;;  %84 = vst [vmem:[#allocation2 + $0x8] sm:$0xff] %v2162_v1  ;;  %v88_v3 = vld [vmem:[%s2408_s2] sm:$0xff]  ;;  %v89_v5 = vld [vmem:[%s2408_s2 + $0x8] sm:$0xff]  ;;  %vm592_vm0 = vcmask 261120   ;;  %s2163_s20 = smov [#allocation9]  }
  0x27   :  { %85 = vst [vmem:[#allocation2 + $0x10] sm:$0xff] %v2162_v1  ;;  %86 = vst [vmem:[#allocation2 + $0x18] sm:$0xff] %v2162_v1  ;;  %118 = vperm.xlu1 %2065, %v112_v2   ;;  %94 = vperm.xlu0 %2064, %v88_v3   ;;  %v196_v6 = vld [vmem:[#allocation3 + $0xf8] sm:$0xff]  ;;  %v195_v7 = vld [vmem:[#allocation3 + $0xf0] sm:$0xff] }
  0x28   :  { %87 = vst [vmem:[#allocation2 + $0x20] sm:$0x3] %v2162_v1  ;;  %1686 = vmatprep.subr.mxu0 %v196_v6  ;;  %v194_v8 = vld [vmem:[#allocation3 + $0xe8] sm:$0xff]  ;;  %v91_v9 = vld [vmem:[%s2408_s2 + $0x18] sm:$0xff]  ;;  %v193_v11 = vld [vmem:[#allocation3 + $0xe0] sm:$0xff] }
  0x29   :  { %1687 = vmatpush3.msra.mxu0 %v196_v6  ;;  %v90_v10 = vld [vmem:[%s2408_s2 + $0x10] sm:$0xff]  ;;  %v140_v12 = vld [vmem:[%s2406_s0] sm:$0xff]  ;;  %v2271_v14 = vld [vmem:[%s2406_s0 + $0x8] sm:$0xff] }
  0x2a   :  { %1688 = vmatprep.subr.mxu0 %v195_v7  ;;  %v179_v13 = vld [vmem:[#allocation3 + $0x78] sm:$0xff]  ;;  %144 = vst [vmem:[#allocation2 + $0x1] sm:$0xff] %v140_v12  ;;  %v115_v15 = vld [vmem:[%s2409_s3 + $0x18] sm:$0xff]  ;;  %v114_v16 = vld [vmem:[%s2409_s3 + $0x10] sm:$0xff]  ;;  %1718 = vmatprep.mubr.f32.mxu0 %v140_v12 }
  0x2b   :  { %123 = vperm.xlu1 %2065, %v113_v4   ;;  %99 = vperm.xlu0 %2064, %v89_v5   ;;  %145 = vst [vmem:[#allocation2 + $0x9] sm:$0xff] %v2271_v14  ;;  %v192_v17 = vld [vmem:[#allocation3 + $0xd8] sm:$0xff]  ;;  %v178_v18 = vld [vmem:[#allocation3 + $0x70] sm:$0xff]  ;;  %v177_v20 = vld [vmem:[#allocation3 + $0x68] sm:$0xff] }
  0x2c   :  { %1689 = vmatpush3.msra.mxu0 %v195_v7  ;;  %1724 = vmatprep.subr.mxu1 %v179_v13  ;;  %v191_v19 = vld [vmem:[#allocation3 + $0xd0] sm:$0xff]  ;;  %v190_v21 = vld [vmem:[#allocation3 + $0xc8] sm:$0xff]  ;;  %v176_v22 = vld [vmem:[#allocation3 + $0x60] sm:$0xff] }
  0x2d   :  { %1690 = vmatprep.subr.mxu0 %v194_v8  ;;  %1725 = vmatpush3.msra.mxu1 %v179_v13  ;;  %v189_v23 = vld [vmem:[#allocation3 + $0xc0] sm:$0xff]  ;;  %v175_v24 = vld [vmem:[#allocation3 + $0x58] sm:$0xff]  ;;  %v2283_v25 = vld [vmem:[%s2406_s0 + $0x10] sm:$0xff] }
  0x2e   :  { %1691 = vmatpush3.msra.mxu0 %v194_v8  ;;  %1726 = vmatprep.subr.mxu1 %v178_v18  ;;  %v2288_v26 = vld [vmem:[%s2406_s0 + $0x18] sm:$0xff]  ;;  %v188_v27 = vld [vmem:[#allocation3 + $0xb8] sm:$0xff]  ;;  %146 = vst [vmem:[#allocation2 + $0x11] sm:$0xff] %v2283_v25  ;;  %v173_v30 = vld [vmem:[#allocation3 + $0x48] sm:$0xff]  ;;  %s1460_s0 = sshll.u32 %s2163_s20, 4  ;;  %s1461_s0 = int_to_ptr.vmem [resolvable:$true] %s1460_s0 }
  0x2f   :  { %109 = vperm.xlu1 %2065, %v91_v9   ;;  %104 = vperm.xlu0 %2064, %v90_v10   ;;  %v174_v28 = vld [vmem:[#allocation3 + $0x50] sm:$0xff]  ;;  %147 = vst [vmem:[#allocation2 + $0x19] sm:$0xff] %v2288_v26  ;;  %v186_v31 = vld [vmem:[#allocation3 + $0xa8] sm:$0xff]  ;;  %v172_v32 = vld [vmem:[#allocation3 + $0x40] sm:$0xff]  ;;  %s2130_s21 = scalar_lea.vmem %s1461_s0, 512  ;;  %p2135_p2 = scmp.lt.s32.totalorder %s1461_s0, %s1461_s0 }
  0x30   :  { %1692 = vmatprep.subr.mxu0 %v193_v11  ;;  %1727 = vmatpush3.msra.mxu1 %v178_v18  ;;  %v187_v29 = vld [vmem:[#allocation3 + $0xb0] sm:$0xff]  ;;  %v185_v33 = vld [vmem:[#allocation3 + $0xa0] sm:$0xff]  ;;  %v171_v34 = vld [vmem:[#allocation3 + $0x38] sm:$0xff]  ;;  %p2131_p1 = scmp.ne.s32.totalorder %s1461_s0, %s2130_s21  ;;  %p2136_p3 = scmp.lt.s32.totalorder %s2130_s21, %s2130_s21 }
  0x31   :  { %1693 = vmatpush3.msra.mxu0 %v193_v11  ;;  %1728 = vmatprep.subr.mxu1 %v177_v20  ;;  %v184_v35 = vld [vmem:[#allocation3 + $0x98] sm:$0xff]  ;;  %v170_v36 = vld [vmem:[#allocation3 + $0x30] sm:$0xff]  ;;  %v169_v38 = vld [vmem:[#allocation3 + $0x28] sm:$0xff] }
  0x32   :  { %1694 = vmatprep.subr.mxu0 %v192_v17  ;;  %1729 = vmatpush3.msra.mxu1 %v177_v20  ;;  %v183_v37 = vld [vmem:[#allocation3 + $0x90] sm:$0xff]  ;;  %v182_v39 = vld [vmem:[#allocation3 + $0x88] sm:$0xff]  ;;  %v168_v40 = vld [vmem:[#allocation3 + $0x20] sm:$0xff]  ;;  %p2137_p4 = por %p2136_p3, %p2135_p2 }
  0x33   :  { %133 = vperm.xlu1 %2065, %v115_v15   ;;  %128 = vperm.xlu0 %2064, %v114_v16   ;;  %v181_v41 = vld [vmem:[#allocation3 + $0x80] sm:$0xff]  ;;  %v167_v42 = vld [vmem:[#allocation3 + $0x18] sm:$0xff]  ;;  %v166_v44 = vld [vmem:[#allocation3 + $0x10] sm:$0xff] }
  0x34   :  { %1695 = vmatpush3.msra.mxu0 %v192_v17  ;;  %1730 = vmatprep.subr.mxu1 %v176_v22  ;;  %v383_v43 = vld [vmem:[#allocation3 + $0x178] sm:$0xff]  ;;  %v382_v45 = vld [vmem:[#allocation3 + $0x170] sm:$0xff]  ;;  %v381_v46 = vld [vmem:[#allocation3 + $0x168] sm:$0xff]  ;;  %p2138_p5 = pnand %p2137_p4, %p2131_p1 }
  0x35   :  { %1696 = vmatprep.subr.mxu0 %v191_v19  ;;  %1731 = vmatpush3.msra.mxu1 %v176_v22  ;;  %v165_v47 = vld [vmem:[#allocation3 + $0x8] sm:$0xff]  ;;  %v380_v48 = vld [vmem:[#allocation3 + $0x160] sm:$0xff]  ;;  %v379_v50 = vld [vmem:[#allocation3 + $0x158] sm:$0xff] }
  0x36   :  { %1697 = vmatpush3.msra.mxu0 %v191_v19  ;;  %1732 = vmatprep.subr.mxu1 %v175_v24  ;;  %v164_v49 = vld [vmem:[#allocation3] sm:$0xff]  ;;  %v378_v51 = vld [vmem:[#allocation3 + $0x150] sm:$0xff]  ;;  %v377_v52 = vld [vmem:[#allocation3 + $0x148] sm:$0xff] }
  0x37   :  { %1698 = vmatprep.subr.mxu0 %v190_v21  ;;  %1733 = vmatpush3.msra.mxu1 %v175_v24  ;;  %v376_v53 = vld [vmem:[#allocation3 + $0x140] sm:$0xff]  ;;  %v375_v54 = vld [vmem:[#allocation3 + $0x138] sm:$0xff]  ;;  %v374_v55 = vld [vmem:[#allocation3 + $0x130] sm:$0xff] }
  0x38   :  { %1699 = vmatpush3.msra.mxu0 %v190_v21  ;;  %1734 = vmatprep.subr.mxu1 %v174_v28  ;;  %v373_v56 = vld [vmem:[#allocation3 + $0x128] sm:$0xff]  ;;  %v372_v57 = vld [vmem:[#allocation3 + $0x120] sm:$0xff]  ;;  %v371_v58 = vld [vmem:[#allocation3 + $0x118] sm:$0xff] }
  0x39   :  { %1700 = vmatprep.subr.mxu0 %v189_v23  ;;  %1735 = vmatpush3.msra.mxu1 %v174_v28  ;;  %v370_v59 = vld [vmem:[#allocation3 + $0x110] sm:$0xff]  ;;  %v369_v60 = vld [vmem:[#allocation3 + $0x108] sm:$0xff]  ;;  %v368_v61 = vld [vmem:[#allocation3 + $0x100] sm:$0xff] }
  0x3a   :  { %1701 = vmatpush3.msra.mxu0 %v189_v23  ;;  %1736 = vmatprep.subr.mxu1 %v173_v30  ;;  %v499_v62 = vld [vmem:[#allocation6 + $0x78] sm:$0xff]  ;;  %v157_v5 = vld [vmem:[#allocation2 + $0xa] sm:$0xff]  ;;  %v151_v11 = vld [vmem:[#allocation2 + $0x18] sm:$0xff] }
  0x3b   :  { %1702 = vmatprep.subr.mxu0 %v188_v27  ;;  %1737 = vmatpush3.msra.mxu1 %v173_v30  ;;  %v156_v63 = vld [vmem:[#allocation2 + $0x2] sm:$0xff]  ;;  %v150_v12 = vld [vmem:[#allocation2 + $0x10] sm:$0xff]  ;;  %v498_v13 = vld [vmem:[#allocation6 + $0x70] sm:$0xff] }
  0x3c   :  { %1703 = vmatpush3.msra.mxu0 %v188_v27  ;;  %1738 = vmatprep.subr.mxu1 %v172_v32  ;;  %v148_v0 = vld [vmem:[#allocation2] sm:$0xff]  ;;  %v149_v6 = vld [vmem:[#allocation2 + $0x8] sm:$0xff]  ;;  %v497_v16 = vld [vmem:[#allocation6 + $0x68] sm:$0xff] }
  0x3d   :  { %1704 = vmatprep.subr.mxu0 %v187_v29  ;;  %1739 = vmatpush3.msra.mxu1 %v172_v32  ;;  %v159_v19 = vld [vmem:[#allocation2 + $0x1a] sm:$0xff]  ;;  %v158_v20 = vld [vmem:[#allocation2 + $0x12] sm:$0xff]  ;;  %v496_v21 = vld [vmem:[#allocation6 + $0x60] sm:$0xff] }
  0x3e   :  { %1705 = vmatpush3.msra.mxu0 %v187_v29  ;;  %1740 = vmatprep.subr.mxu1 %v171_v34  ;;  %v494_v27 = vld [vmem:[#allocation6 + $0x50] sm:$0xff]  ;;  %v493_v28 = vld [vmem:[#allocation6 + $0x48] sm:$0xff]  ;;  %v492_v29 = vld [vmem:[#allocation6 + $0x40] sm:$0xff] }
  0x3f   :  { %1706 = vmatprep.subr.mxu0 %v186_v31  ;;  %1741 = vmatpush3.msra.mxu1 %v171_v34  ;;  %v491_v30 = vld [vmem:[#allocation6 + $0x38] sm:$0xff]  ;;  %v489_v32 = vld [vmem:[#allocation6 + $0x28] sm:$0xff] }
  0x40   :  { %1707 = vmatpush3.msra.mxu0 %v186_v31  ;;  %1742 = vmatprep.subr.mxu1 %v170_v36  ;;  %v490_v31 = vld [vmem:[#allocation6 + $0x30] sm:$0xff]  ;;  %v487_v34 = vld [vmem:[#allocation6 + $0x18] sm:$0xff] }
  0x41   :  { %1708 = vmatprep.subr.mxu0 %v185_v33  ;;  %1743 = vmatpush3.msra.mxu1 %v170_v36  ;;  %v485_v36 = vld [vmem:[#allocation6 + $0x8] sm:$0xff] }
  0x42   :  { %1709 = vmatpush3.msra.mxu0 %v185_v33  ;;  %1744 = vmatprep.subr.mxu1 %v169_v38  ;;  %v488_v33 = vld [vmem:[#allocation6 + $0x20] sm:$0xff] }
  0x43   :  { %1710 = vmatprep.subr.mxu0 %v184_v35  ;;  %1745 = vmatpush3.msra.mxu1 %v169_v38 }
  0x44   :  { %1711 = vmatpush3.msra.mxu0 %v184_v35  ;;  %1746 = vmatprep.subr.mxu1 %v168_v40  ;;  %v486_v35 = vld [vmem:[#allocation6 + $0x10] sm:$0xff] }
  0x45   :  { %1712 = vmatprep.subr.mxu0 %v183_v37  ;;  %1747 = vmatpush3.msra.mxu1 %v168_v40 }
  0x46   :  { %1713 = vmatpush3.msra.mxu0 %v183_v37  ;;  %1748 = vmatprep.subr.mxu1 %v167_v42  ;;  %v484_v37 = vld [vmem:[#allocation6] sm:$0xff] }
  0x47   :  { %1714 = vmatprep.subr.mxu0 %v182_v39  ;;  %1749 = vmatpush3.msra.mxu1 %v167_v42 }
  0x48   :  { %1715 = vmatpush3.msra.mxu0 %v182_v39  ;;  %1750 = vmatprep.subr.mxu1 %v166_v44 }
  0x49   :  { %1716 = vmatprep.subr.mxu0 %v181_v41  ;;  %1751 = vmatpush3.msra.mxu1 %v166_v44 }
  0x4a   :  { %1717 = vmatpush3.msra.mxu0 %v181_v41  ;;  %1752 = vmatprep.subr.mxu1 %v165_v47 }
  0x4b   :  { %1762 = vmatprep.subr.mxu0 %v383_v43  ;;  %1719 = vmatmul.mubr.f32.vlgmr.msra.gmra.mxu0 %v2271_v14 }
  0x4c   :  { %1763 = vmatpush3.msra.mxu0 %v383_v43  ;;  %1721 = vmatprep.mubr.f32.mxu0 %v2283_v25 }
  0x4d   :  { %1764 = vmatprep.subr.mxu0 %v382_v45  ;;  %1753 = vmatpush3.msra.mxu1 %v165_v47 }
  0x4e   :  { %1765 = vmatpush3.msra.mxu0 %v382_v45  ;;  %1754 = vmatprep.subr.mxu1 %v164_v49 }
  0x4f   :  { %1766 = vmatprep.subr.mxu0 %v381_v46  ;;  %1722 = vmatmul.mubr.f32.gmra.mxu0 %v2288_v26  ;;  %v495_v26 = vld [vmem:[#allocation6 + $0x58] sm:$0xff] }
  0x50   :  { %1767 = vmatpush3.msra.mxu0 %v381_v46  ;;  %1755 = vmatpush3.msra.mxu1 %v164_v49  ;;  %v1473_v49 = vld [vmem:[%s2411_s5] ss:$0 sm:$0xff] }
  0x51   :  { %1768 = vmatprep.subr.mxu0 %v380_v48  ;;  %1800 = vmatprep.subr.mxu1 %v499_v62 }
  0x52   :  { %1769 = vmatpush3.msra.mxu0 %v380_v48 }
  0x53   :  { %1770 = vmatprep.subr.mxu0 %v379_v50 }
  0x54   :  { %1771 = vmatpush3.msra.mxu0 %v379_v50 }
  0x55   :  { %1772 = vmatprep.subr.mxu0 %v378_v51 }
  0x56   :  { %1773 = vmatpush3.msra.mxu0 %v378_v51 }
  0x57   :  { %1774 = vmatprep.subr.mxu0 %v377_v52 }
  0x58   :  { %1775 = vmatpush3.msra.mxu0 %v377_v52 }
  0x59   :  { %1776 = vmatprep.subr.mxu0 %v376_v53 }
  0x5a   :  { %1777 = vmatpush3.msra.mxu0 %v376_v53 }
  0x5b   :  { %1778 = vmatprep.subr.mxu0 %v375_v54 }
  0x5c   :  { %1779 = vmatpush3.msra.mxu0 %v375_v54 }
  0x5d   :  { %1780 = vmatprep.subr.mxu0 %v374_v55 }
  0x5e   :  { %1781 = vmatpush3.msra.mxu0 %v374_v55 }
  0x5f   :  { %1782 = vmatprep.subr.mxu0 %v373_v56 }
  0x60   :  { %1783 = vmatpush3.msra.mxu0 %v373_v56 }
  0x61   :  { %1784 = vmatprep.subr.mxu0 %v372_v57 }
  0x62   :  { %1785 = vmatpush3.msra.mxu0 %v372_v57 }
  0x63   :  { %1786 = vmatprep.subr.mxu0 %v371_v58 }
  0x64   :  { %1787 = vmatpush3.msra.mxu0 %v371_v58 }
  0x65   :  { %1788 = vmatprep.subr.mxu0 %v370_v59 }
  0x66   :  { %1789 = vmatpush3.msra.mxu0 %v370_v59 }
  0x67   :  { %1790 = vmatprep.subr.mxu0 %v369_v60 }
  0x68   :  { %1791 = vmatpush3.msra.mxu0 %v369_v60 }
  0x69   :  { %1792 = vmatprep.subr.mxu0 %v368_v61 }
  0x6a   :  { %1793 = vmatpush3.msra.mxu0 %v368_v61 }
  0xa2   :  { %v2295_v1 = vpop.permute.xlu1 %118  ;;  %v2297_v2 = vpop.permute.xlu0 %94 }
  0xa3   :  { %v160_v3 = vmul.f32 %v156_v63, %v2295_v1  ;;  %v152_v4 = vmul.f32 %v148_v0, %v2297_v2  ;;  %v2325_v63 = vld [vmem:[%s2407_s1] sm:$0xff] }
  0xa5   :  { %1756 = vmatprep.mubr.f32.mxu1 %v152_v4  ;;  %1794 = vmatprep.mubr.f32.mxu0 %v160_v3 }
  0xa6   :  { %v2301_v7 = vpop.permute.xlu1 %123  ;;  %v2303_v8 = vpop.permute.xlu0 %99 }
  0xa7   :  { %v161_v9 = vmul.f32 %v157_v5, %v2301_v7  ;;  %v153_v10 = vmul.f32 %v149_v6, %v2303_v8  ;;  %v2332_v6 = vld [vmem:[%s2407_s1 + $0x8] sm:$0xff] }
  0xa9   :  { %1757 = vmatmul.mubr.f32.vlgmr.msra.gmra.mxu1 %v153_v10  ;;  %1795 = vmatmul.mubr.f32.vlgmr.msra.gmra.mxu0 %v161_v9  ;;  %v2337_v9 = vld [vmem:[%s2407_s1 + $0x10] sm:$0xff]  ;;  %v2346_v10 = vld [vmem:[%s2407_s1 + $0x18] sm:$0xff] }
  0xaa   :  { %v2307_v14 = vpop.permute.xlu1 %109  ;;  %v2309_v15 = vpop.permute.xlu0 %104  ;;  %1801 = vmatpush3.msra.mxu1 %v499_v62 }
  0xab   :  { %v155_v17 = vmul.f32 %v151_v11, %v2307_v14  ;;  %v154_v18 = vmul.f32 %v150_v12, %v2309_v15  ;;  %1802 = vmatprep.subr.mxu1 %v498_v13  ;;  %v800_v11 = vld [vmem:[#allocation3 + $0x278] sm:$0xff]  ;;  %v799_v12 = vld [vmem:[#allocation3 + $0x270] sm:$0xff] }
  0xac   :  { %1803 = vmatpush3.msra.mxu1 %v498_v13  ;;  %v798_v13 = vld [vmem:[#allocation3 + $0x268] sm:$0xff] }
  0xad   :  { %1759 = vmatprep.mubr.f32.mxu1 %v154_v18  ;;  %1804 = vmatprep.subr.mxu1 %v497_v16  ;;  %v795_v18 = vld [vmem:[#allocation3 + $0x250] sm:$0xff] }
  0xae   :  { %v2313_v22 = vpop.permute.xlu1 %133  ;;  %v2315_v23 = vpop.permute.xlu0 %128  ;;  %1760 = vmatmul.mubr.f32.gmra.mxu1 %v155_v17  ;;  %v796_v17 = vld [vmem:[#allocation3 + $0x258] sm:$0xff] }
  0xaf   :  { %v163_v24 = vmul.f32 %v159_v19, %v2313_v22  ;;  %v162_v25 = vmul.f32 %v158_v20, %v2315_v23  ;;  %1805 = vmatpush3.msra.mxu1 %v497_v16  ;;  %v797_v16 = vld [vmem:[#allocation3 + $0x260] sm:$0xff]  ;;  %v783_v19 = vld [vmem:[#allocation3 + $0x1f8] sm:$0xff]  ;;  %v794_v20 = vld [vmem:[#allocation3 + $0x248] sm:$0xff] }
  0xb0   :  { %1806 = vmatprep.subr.mxu1 %v496_v21  ;;  %1890 = vmatprep.subr.mxu0 %v783_v19 }
  0xb1   :  { %1797 = vmatprep.mubr.f32.mxu0 %v162_v25  ;;  %1807 = vmatpush3.msra.mxu1 %v496_v21  ;;  %v782_v21 = vld [vmem:[#allocation3 + $0x1f0] sm:$0xff]  ;;  %v781_v25 = vld [vmem:[#allocation3 + $0x1e8] sm:$0xff] }
  0xb2   :  { %1798 = vmatmul.mubr.f32.gmra.mxu0 %v163_v24  ;;  %1808 = vmatprep.subr.mxu1 %v495_v26  ;;  %v793_v24 = vld [vmem:[#allocation3 + $0x240] sm:$0xff] }
  0xb3   :  { %1809 = vmatpush3.msra.mxu1 %v495_v26  ;;  %1891 = vmatpush3.msra.mxu0 %v783_v19  ;;  %v792_v26 = vld [vmem:[#allocation3 + $0x238] sm:$0xff] }
  0xb4   :  { %1810 = vmatprep.subr.mxu1 %v494_v27  ;;  %1892 = vmatprep.subr.mxu0 %v782_v21 }
  0xb5   :  { %1811 = vmatpush3.msra.mxu1 %v494_v27  ;;  %1893 = vmatpush3.msra.mxu0 %v782_v21  ;;  %v780_v27 = vld [vmem:[#allocation3 + $0x1e0] sm:$0xff] }
  0xb6   :  { %1812 = vmatprep.subr.mxu1 %v493_v28  ;;  %1894 = vmatprep.subr.mxu0 %v781_v25 }
  0xb7   :  { %1813 = vmatpush3.msra.mxu1 %v493_v28  ;;  %1895 = vmatpush3.msra.mxu0 %v781_v25  ;;  %v791_v28 = vld [vmem:[#allocation3 + $0x230] sm:$0xff] }
  0xb8   :  { %1814 = vmatprep.subr.mxu1 %v492_v29  ;;  %1896 = vmatprep.subr.mxu0 %v780_v27 }
  0xb9   :  { %1815 = vmatpush3.msra.mxu1 %v492_v29  ;;  %1897 = vmatpush3.msra.mxu0 %v780_v27  ;;  %v779_v29 = vld [vmem:[#allocation3 + $0x1d8] sm:$0xff] }
  0xba   :  { %1816 = vmatprep.subr.mxu1 %v491_v30  ;;  %1898 = vmatprep.subr.mxu0 %v779_v29 }
  0xbb   :  { %1817 = vmatpush3.msra.mxu1 %v491_v30  ;;  %v790_v30 = vld [vmem:[#allocation3 + $0x228] sm:$0xff]  ;;  %1899 = vmatpush3.msra.mxu0 %v779_v29 }
  0xbc   :  { %1818 = vmatprep.subr.mxu1 %v490_v31 }
  0xbd   :  { %1819 = vmatpush3.msra.mxu1 %v490_v31  ;;  %v778_v31 = vld [vmem:[#allocation3 + $0x1d0] sm:$0xff] }
  0xbe   :  { %1820 = vmatprep.subr.mxu1 %v489_v32  ;;  %1900 = vmatprep.subr.mxu0 %v778_v31 }
  0xbf   :  { %1821 = vmatpush3.msra.mxu1 %v489_v32  ;;  %v789_v32 = vld [vmem:[#allocation3 + $0x220] sm:$0xff]  ;;  %1901 = vmatpush3.msra.mxu0 %v778_v31 }
  0xc0   :  { %1822 = vmatprep.subr.mxu1 %v488_v33 }
  0xc1   :  { %1823 = vmatpush3.msra.mxu1 %v488_v33  ;;  %v777_v33 = vld [vmem:[#allocation3 + $0x1c8] sm:$0xff] }
  0xc2   :  { %1824 = vmatprep.subr.mxu1 %v487_v34  ;;  %1902 = vmatprep.subr.mxu0 %v777_v33 }
  0xc3   :  { %1825 = vmatpush3.msra.mxu1 %v487_v34  ;;  %v788_v34 = vld [vmem:[#allocation3 + $0x218] sm:$0xff]  ;;  %1903 = vmatpush3.msra.mxu0 %v777_v33 }
  0xc4   :  { %1826 = vmatprep.subr.mxu1 %v486_v35 }
  0xc5   :  { %1827 = vmatpush3.msra.mxu1 %v486_v35  ;;  %v776_v35 = vld [vmem:[#allocation3 + $0x1c0] sm:$0xff] }
  0xc6   :  { %1828 = vmatprep.subr.mxu1 %v485_v36  ;;  %1904 = vmatprep.subr.mxu0 %v776_v35 }
  0xc7   :  { %1829 = vmatpush3.msra.mxu1 %v485_v36  ;;  %v787_v36 = vld [vmem:[#allocation3 + $0x210] sm:$0xff]  ;;  %1905 = vmatpush3.msra.mxu0 %v776_v35 }
  0xc8   :  { %1830 = vmatprep.subr.mxu1 %v484_v37 }
  0xc9   :  { %1831 = vmatpush3.msra.mxu1 %v484_v37  ;;  %v775_v37 = vld [vmem:[#allocation3 + $0x1b8] sm:$0xff] }
  0xca   :  { %1906 = vmatprep.subr.mxu0 %v775_v37 }
  0xcb   :  { %1907 = vmatpush3.msra.mxu0 %v775_v37 }
 0x10b   :  { %v1720_v38 = vpop.f32.mrf.mxu0 }
 0x10d   :  { %v263_v39 = vpop.f32.mrf.mxu0 }
 0x10f   :  { %v1723_v40 = vpop.f32.mrf.mxu0 }
 0x111   :  { %v273_v41 = vpop.f32.mrf.mxu0 }
 0x169   :  { %v1758_v42 = vpop.f32.mrf.mxu1  ;;  %v1796_v43 = vpop.f32.mrf.mxu0 }
 0x16a   :  { %v354_v44 = vadd.f32 %v1758_v42, %v1720_v38  ;;  %v786_v38 = vld [vmem:[#allocation3 + $0x208] sm:$0xff]  ;;  %v2350_v42 = vld [vmem:[#allocation3 + $0x2f8] sm:$0xff] }
 0x16b   :  { %v348_v45 = vpop.f32.mrf.mxu1  ;;  %v450_v48 = vpop.f32.mrf.mxu0 }
 0x16c   :  { %v349_v46 = vadd.f32 %v348_v45, %v263_v39  ;;  %v470_v47 = vadd.f32 %v1796_v43, %v354_v44  ;;  %v774_v39 = vld [vmem:[#allocation3 + $0x1b0] sm:$0xff]  ;;  %v772_v43 = vld [vmem:[#allocation3 + $0x1a0] sm:$0xff]  ;;  %v771_v44 = vld [vmem:[#allocation3 + $0x198] sm:$0xff] }
 0x16d   :  { %1908 = vmatprep.subr.mxu0 %v774_v39  ;;  %v770_v45 = vld [vmem:[#allocation3 + $0x190] sm:$0xff] }
 0x16e   :  { %v469_v50 = vadd.f32 %v450_v48, %v349_v46  ;;  %v1761_v51 = vpop.f32.mrf.mxu1  ;;  %v481_v54 = vadd.f32 %v1473_v49, %v470_v47  ;;  %1909 = vmatpush3.msra.mxu0 %v774_v39  ;;  %v769_v46 = vld [vmem:[#allocation3 + $0x188] sm:$0xff]  ;;  %v768_v47 = vld [vmem:[#allocation3 + $0x180] sm:$0xff] }
 0x16f   :  { %v364_v55 = vadd.f32 %v1761_v51, %v1723_v40  ;;  %v785_v40 = vld [vmem:[#allocation3 + $0x200] sm:$0xff] }
 0x170   :  { %v480_v52 = vadd.f32 %v1473_v49, %v469_v50  ;;  %v358_v53 = vpop.f32.mrf.mxu1 }
 0x171   :  { %v359_v57 = vadd.f32 %v358_v53, %v273_v41  ;;  %v773_v41 = vld [vmem:[#allocation3 + $0x1a8] sm:$0xff] }
 0x172   :  { %v1799_v56 = vpop.f32.mrf.mxu0  ;;  %1832 = vmatprep.mubr.f32.mxu1 %v480_v52  ;;  %1910 = vmatprep.subr.mxu0 %v773_v41 }
 0x173   :  { %1833 = vmatmul.mubr.f32.vlgmr.msra.gmra.mxu1 %v481_v54  ;;  %v472_v58 = vadd.f32 %v1799_v56, %v364_v55  ;;  %1911 = vmatpush3.msra.mxu0 %v773_v41 }
 0x174   :  { %v460_v59 = vpop.f32.mrf.mxu0  ;;  %1912 = vmatprep.subr.mxu0 %v772_v43 }
 0x175   :  { %v471_v60 = vadd.f32 %v460_v59, %v359_v57  ;;  %v483_v62 = vadd.f32 %v1473_v49, %v472_v58  ;;  %1913 = vmatpush3.msra.mxu0 %v772_v43 }
 0x176   :  { %1914 = vmatprep.subr.mxu0 %v771_v44 }
 0x177   :  { %v482_v61 = vadd.f32 %v1473_v49, %v471_v60  ;;  %1915 = vmatpush3.msra.mxu0 %v771_v44  ;;  %v1474_v49 = vld [vmem:[%s2413_s7] ss:$0 sm:$0xff] }
 0x178   :  { %1916 = vmatprep.subr.mxu0 %v770_v45 }
 0x179   :  { %1835 = vmatprep.mubr.f32.mxu1 %v482_v61  ;;  %1917 = vmatpush3.msra.mxu0 %v770_v45 }
 0x17a   :  { %1836 = vmatmul.mubr.f32.gmra.mxu1 %v483_v62  ;;  %1918 = vmatprep.subr.mxu0 %v769_v46 }
 0x17b   :  { %1846 = vmatprep.mubr.msk.f32.mxu1 %vm592_vm0, %v2325_v63  ;;  %1919 = vmatpush3.msra.mxu0 %v769_v46 }
 0x17c   :  { %1920 = vmatprep.subr.mxu0 %v768_v47 }
 0x17d   :  { %1921 = vmatpush3.msra.mxu0 %v768_v47 }
 0x233   :  { %v1834_v0 = vpop.f32.mrf.mxu1 }
 0x235   :  { %v566_v3 = vpop.f32.mrf.mxu1 }
 0x23a   :  { %v1837_v4 = vpop.f32.mrf.mxu1 }
 0x23b   :  { %1838 = vmatprep.subr.mxu1 %v1837_v4 }
 0x23c   :  { %v576_v5 = vpop.f32.mrf.mxu1  ;;  %1839 = vmatpush3.msra.mxu1 %v1837_v4 }
 0x23d   :  { %1840 = vmatprep.subr.mxu1 %v576_v5 }
 0x23e   :  { %1841 = vmatpush3.msra.mxu1 %v576_v5 }
 0x23f   :  { %1842 = vmatprep.subr.mxu1 %v1834_v0 }
 0x240   :  { %1843 = vmatpush3.msra.mxu1 %v1834_v0 }
 0x241   :  { %1844 = vmatprep.subr.mxu1 %v566_v3 }
 0x242   :  { %1845 = vmatpush3.msra.mxu1 %v566_v3 }
 0x243   :  { %1847 = vmatmul.mubr.msk.f32.vlgmr.msra.gmra.mxu1 %vm592_vm0, %v2332_v6  ;;  %1852 = vmatprep.subr.mxu1 %v800_v11 }
 0x244   :  { %1849 = vmatprep.mubr.msk.f32.mxu1 %vm592_vm0, %v2337_v9  ;;  %1853 = vmatpush3.msra.mxu1 %v800_v11 }
 0x245   :  { %1854 = vmatprep.subr.mxu1 %v799_v12 }
 0x246   :  { %1855 = vmatpush3.msra.mxu1 %v799_v12 }
 0x247   :  { %1850 = vmatmul.mubr.msk.f32.gmra.mxu1 %vm592_vm0, %v2346_v10  ;;  %1856 = vmatprep.subr.mxu1 %v798_v13 }
 0x248   :  { %1857 = vmatpush3.msra.mxu1 %v798_v13 }
 0x249   :  { %1858 = vmatprep.subr.mxu1 %v797_v16 }
 0x24a   :  { %1859 = vmatpush3.msra.mxu1 %v797_v16 }
 0x24b   :  { %1860 = vmatprep.subr.mxu1 %v796_v17 }
 0x24c   :  { %1861 = vmatpush3.msra.mxu1 %v796_v17 }
 0x24d   :  { %1862 = vmatprep.subr.mxu1 %v795_v18 }
 0x24e   :  { %1863 = vmatpush3.msra.mxu1 %v795_v18 }
 0x24f   :  { %1864 = vmatprep.subr.mxu1 %v794_v20 }
 0x250   :  { %1865 = vmatpush3.msra.mxu1 %v794_v20 }
 0x251   :  { %1866 = vmatprep.subr.mxu1 %v793_v24 }
 0x252   :  { %1867 = vmatpush3.msra.mxu1 %v793_v24 }
 0x253   :  { %1868 = vmatprep.subr.mxu1 %v792_v26 }
 0x254   :  { %1869 = vmatpush3.msra.mxu1 %v792_v26 }
 0x255   :  { %1870 = vmatprep.subr.mxu1 %v791_v28 }
 0x256   :  { %1871 = vmatpush3.msra.mxu1 %v791_v28 }
 0x257   :  { %1872 = vmatprep.subr.mxu1 %v790_v30 }
 0x258   :  { %1873 = vmatpush3.msra.mxu1 %v790_v30 }
 0x259   :  { %1874 = vmatprep.subr.mxu1 %v789_v32 }
 0x25a   :  { %1875 = vmatpush3.msra.mxu1 %v789_v32  ;;  %v724_v32 = vlaneseq }
 0x25b   :  { %1876 = vmatprep.subr.mxu1 %v788_v34 }
 0x25c   :  { %1877 = vmatpush3.msra.mxu1 %v788_v34  ;;  %v725_v33 = vshrl.u32 %v724_v32, 7  ;;  %v718_v34 = vld [vmem:[%s2414_s8] sm:$0x1]  ;;  %v1099_v32 = vld [vmem:[#allocation6 + $0xc8] sm:$0xff] }
 0x25d   :  { %1878 = vmatprep.subr.mxu1 %v787_v36 }
 0x25e   :  { %1879 = vmatpush3.msra.mxu1 %v787_v36  ;;  %v2359_v35 = vsub.s32 0, %v725_v33  ;;  %v1097_v33 = vld [vmem:[#allocation6 + $0xb8] sm:$0xff] }
 0x25f   :  { %1880 = vmatprep.subr.mxu1 %v786_v38 }
 0x260   :  { %1881 = vmatpush3.msra.mxu1 %v786_v38  ;;  %v720_v38 = vld [vmem:[%s2415_s9] sm:$0x1] }
 0x261   :  { %1882 = vmatprep.subr.mxu1 %v785_v40 }
 0x262   :  { %1883 = vmatpush3.msra.mxu1 %v785_v40 }
 0x263   :  { %1928 = vmatprep.subr.mxu1 %v2350_v42 }
 0x303   :  { %v1848_v48 = vpop.f32.mrf.mxu1 }
 0x304   :  { %v677_v51 = vadd.f32 %v1848_v48, %v1474_v49 }
 0x305   :  { %v671_v50 = vpop.f32.mrf.mxu1 }
 0x306   :  { %v672_v52 = vadd.f32 %v1474_v49, %v671_v50  ;;  %v701_v56 = vmul.f32 %v677_v51, %v677_v51 }
 0x307   :  { %v1851_v53 = vpop.f32.mrf.mxu1 }
 0x308   :  { %v700_v54 = vmul.f32 %v672_v52, %v672_v52  ;;  %v690_v57 = vadd.f32 %v677_v51, %v672_v52  ;;  %v687_v58 = vadd.f32 %v1851_v53, %v1474_v49 }
 0x309   :  { %v681_v55 = vpop.f32.mrf.mxu1 }
 0x30a   :  { %v682_v59 = vadd.f32 %v1474_v49, %v681_v55  ;;  %v704_v60 = vadd.f32 %v701_v56, %v700_v54  ;;  %v703_v0 = vmul.f32 %v687_v58, %v687_v58 }
 0x30c   :  { %v691_v61 = vadd.f32 %v690_v57, %v682_v59  ;;  %v702_v62 = vmul.f32 %v682_v59, %v682_v59 }
 0x30e   :  { %v692_v3 = vadd.f32 %v691_v61, %v687_v58  ;;  %v705_v4 = vadd.f32 %v704_v60, %v702_v62  ;;  %v986_v60 = vld [vmem:[#allocation3 + $0x2f0] sm:$0xff] }
 0x310   :  { %v693_v5 = vrot.slane %v692_v3, 4  ;;  %v706_v11 = vadd.f32 %v705_v4, %v703_v0 }
 0x312   :  { %v694_v12 = vadd.f32 %v693_v5, %v692_v3  ;;  %v707_v13 = vrot.slane %v706_v11, 4  ;;  %v982_v3 = vld [vmem:[#allocation3 + $0x2d0] sm:$0xff] }
 0x314   :  { %v695_v16 = vrot.slane %v694_v12, 2  ;;  %v708_v17 = vadd.f32 %v707_v13, %v706_v11  ;;  %v981_v11 = vld [vmem:[#allocation3 + $0x2c8] sm:$0xff] }
 0x316   :  { %v696_v18 = vadd.f32 %v695_v16, %v694_v12  ;;  %v709_v19 = vrot.slane %v708_v17, 2  ;;  %v980_v16 = vld [vmem:[#allocation3 + $0x2c0] sm:$0xff] }
 0x318   :  { %v697_v20 = vrot.slane %v696_v18, 1  ;;  %v710_v21 = vadd.f32 %v709_v19, %v708_v17  ;;  %v977_v17 = vld [vmem:[#allocation3 + $0x2a8] sm:$0xff]  ;;  %v974_v19 = vld [vmem:[#allocation3 + $0x290] sm:$0xff] }
 0x31a   :  { %v698_v24 = vadd.f32 %v697_v20, %v696_v18  ;;  %v711_v25 = vrot.slane %v710_v21, 1  ;;  %v975_v18 = vld [vmem:[#allocation3 + $0x298] sm:$0xff]  ;;  %v972_v20 = vld [vmem:[#allocation3 + $0x280] sm:$0xff] }
 0x31c   :  { %v699_v26 = vmul.f32 0.03125, %v698_v24  ;;  %v712_v27 = vadd.f32 %v711_v25, %v710_v21 }
 0x31e   :  { %v713_v28 = vmul.f32 0.03125, %v712_v27  ;;  %v714_v29 = vmul.f32 %v699_v26, %v699_v26 }
 0x320   :  { %v715_v30 = vsub.f32 %v713_v28, %v714_v29  ;;  %v1105_v29 = vld [vmem:[#allocation6 + $0xf8] sm:$0xff] }
 0x321   :  { %1966 = vmatprep.subr.mxu0 %v1105_v29 }
 0x322   :  { %v716_v31 = vadd.f32 1e-05, %v715_v30  ;;  %v1104_v30 = vld [vmem:[#allocation6 + $0xf0] sm:$0xff] }
 0x324   :  { %2066 = vrsqrt.f32 %v716_v31  ;;  %v1103_v31 = vld [vmem:[#allocation6 + $0xe8] sm:$0xff] }
 0x331   :  { %v2067_v36 = vpop.eup %2066 }
 0x332   :  { %v719_v37 = vmul.f32 %v2067_v36, %v718_v34  ;;  %v1096_v34 = vld [vmem:[#allocation6 + $0xb0] sm:$0xff]  ;;  %v1095_v36 = vld [vmem:[#allocation6 + $0xa8] sm:$0xff] }
 0x334   :  { %v721_v39 = vmul.f32 %v719_v37, %v699_v26  ;;  %v727_v40 = vrot.slane %v719_v37, %v2359_v35  ;;  %v1094_v37 = vld [vmem:[#allocation6 + $0xa0] sm:$0xff] }
 0x336   :  { %v722_v41 = vsub.f32 %v720_v38, %v721_v39  ;;  %v731_v43 = vmul.f32 %v727_v40, %v682_v59  ;;  %v729_v44 = vmul.f32 %v727_v40, %v672_v52  ;;  %v730_v46 = vmul.f32 %v727_v40, %v677_v51  ;;  %v985_v51 = vld [vmem:[#allocation3 + $0x2e8] sm:$0xff]  ;;  %v984_v52 = vld [vmem:[#allocation3 + $0x2e0] sm:$0xff]  ;;  %v1093_v38 = vld [vmem:[#allocation6 + $0x98] sm:$0xff] }
 0x337   :  { %v732_v47 = vmul.f32 %v727_v40, %v687_v58  ;;  %v983_v58 = vld [vmem:[#allocation3 + $0x2d8] sm:$0xff]  ;;  %v1092_v39 = vld [vmem:[#allocation6 + $0x90] sm:$0xff]  ;;  %v1091_v40 = vld [vmem:[#allocation6 + $0x88] sm:$0xff] }
 0x338   :  { %v737_v45 = vrot.slane %v722_v41, %v2359_v35  ;;  %v1090_v41 = vld [vmem:[#allocation6 + $0x80] sm:$0xff] }
 0x33a   :  { %v739_v48 = vadd.f32 %v737_v45, %v729_v44  ;;  %v740_v49 = vadd.f32 %v737_v45, %v730_v46  ;;  %v741_v50 = vadd.f32 %v737_v45, %v731_v43  ;;  %v742_v53 = vadd.f32 %v737_v45, %v732_v47 }
 0x33c   :  { %v743_v54 = vmax.f32 %v739_v48, 0.0  ;;  %v744_v55 = vmax.f32 %v740_v49, 0.0  ;;  %v745_v56 = vmax.f32 %v741_v50, 0.0  ;;  %v746_v57 = vmax.f32 %v742_v53, 0.0 }
 0x33e   :  { %747 = vst [vmem:[#allocation2 + $0x1] sm:$0xff] %v743_v54  ;;  %1884 = vmatprep.mubr.f32.mxu1 %v743_v54  ;;  %748 = vst [vmem:[#allocation2 + $0x9] sm:$0xff] %v744_v55 }
 0x33f   :  { %749 = vst [vmem:[#allocation2 + $0x11] sm:$0xff] %v745_v56  ;;  %750 = vst [vmem:[#allocation2 + $0x19] sm:$0xff] %v746_v57  ;;  %1885 = vmatmul.mubr.f32.vlgmr.msra.gmra.mxu1 %v744_v55 }
 0x340   :  { %1929 = vmatpush3.msra.mxu1 %v2350_v42  ;;  %1887 = vmatprep.mubr.f32.mxu1 %v745_v56 }
 0x341   :  { %1930 = vmatprep.subr.mxu1 %v986_v60 }
 0x342   :  { %1931 = vmatpush3.msra.mxu1 %v986_v60  ;;  %v1480_v60 = vld [vmem:[%s2411_s5 + $0x1] ss:$0 sm:$0xff] }
 0x343   :  { %1932 = vmatprep.subr.mxu1 %v985_v51  ;;  %1888 = vmatmul.mubr.f32.gmra.mxu1 %v746_v57 }
 0x344   :  { %1933 = vmatpush3.msra.mxu1 %v985_v51 }
 0x345   :  { %1934 = vmatprep.subr.mxu1 %v984_v52  ;;  %v751_v59 = vld [vmem:[#allocation2] sm:$0xff]  ;;  %v752_v62 = vld [vmem:[#allocation2 + $0x8] sm:$0xff] }
 0x346   :  { %v759_v61 = vld [vmem:[#allocation2 + $0x2] sm:$0xff]  ;;  %1935 = vmatpush3.msra.mxu1 %v984_v52  ;;  %v755_v0 = vmul.f32 %v751_v59, %v2297_v2  ;;  %v756_v42 = vmul.f32 %v752_v62, %v2303_v8  ;;  %v753_v5 = vld [vmem:[#allocation2 + $0x10] sm:$0xff]  ;;  %v754_v13 = vld [vmem:[#allocation2 + $0x18] sm:$0xff] }
 0x347   :  { %v763_v4 = vmul.f32 %v759_v61, %v2295_v1  ;;  %1936 = vmatprep.subr.mxu1 %v983_v58  ;;  %v757_v12 = vmul.f32 %v753_v5, %v2309_v15  ;;  %v758_v1 = vmul.f32 %v754_v13, %v2307_v14  ;;  %v979_v2 = vld [vmem:[#allocation3 + $0x2b8] sm:$0xff]  ;;  %v978_v8 = vld [vmem:[#allocation3 + $0x2b0] sm:$0xff]  ;;  %v976_v15 = vld [vmem:[#allocation3 + $0x2a0] sm:$0xff] }
 0x348   :  { %1937 = vmatpush3.msra.mxu1 %v983_v58  ;;  %1922 = vmatprep.mubr.f32.mxu0 %v755_v0  ;;  %v973_v14 = vld [vmem:[#allocation3 + $0x288] sm:$0xff]  ;;  %v762_v27 = vld [vmem:[#allocation2 + $0x1a] sm:$0xff] }
 0x349   :  { %1938 = vmatprep.subr.mxu1 %v982_v3  ;;  %1960 = vmatprep.mubr.f32.mxu1 %v763_v4  ;;  %v760_v21 = vld [vmem:[#allocation2 + $0xa] sm:$0xff]  ;;  %v761_v24 = vld [vmem:[#allocation2 + $0x12] sm:$0xff]  ;;  %v766_v28 = vmul.f32 %v762_v27, %v2313_v22 }
 0x34a   :  { %1923 = vmatmul.mubr.f32.vlgmr.msra.gmra.mxu0 %v756_v42  ;;  %1939 = vmatpush3.msra.mxu1 %v982_v3  ;;  %v764_v25 = vmul.f32 %v760_v21, %v2301_v7  ;;  %v765_v26 = vmul.f32 %v761_v24, %v2315_v23  ;;  %v1102_v7 = vld [vmem:[#allocation6 + $0xe0] sm:$0xff]  ;;  %v1101_v23 = vld [vmem:[#allocation6 + $0xd8] sm:$0xff]  ;;  %v1100_v22 = vld [vmem:[#allocation6 + $0xd0] sm:$0xff] }
 0x34b   :  { %1925 = vmatprep.mubr.f32.mxu0 %v757_v12  ;;  %1940 = vmatprep.subr.mxu1 %v981_v11  ;;  %v1346_v21 = vld [vmem:[#allocation8 + $0x18] sm:$0xff]  ;;  %v1345_v24 = vld [vmem:[#allocation8 + $0x10] sm:$0xff] }
 0x34c   :  { %1941 = vmatpush3.msra.mxu1 %v981_v11  ;;  %1967 = vmatpush3.msra.mxu0 %v1105_v29 }
 0x34d   :  { %1942 = vmatprep.subr.mxu1 %v980_v16  ;;  %1968 = vmatprep.subr.mxu0 %v1104_v30 }
 0x34e   :  { %1926 = vmatmul.mubr.f32.gmra.mxu0 %v758_v1  ;;  %1943 = vmatpush3.msra.mxu1 %v980_v16  ;;  %v1358_v1 = vld [vmem:[#allocation8 + $0x78] sm:$0xff] }
 0x34f   :  { %1944 = vmatprep.subr.mxu1 %v979_v2  ;;  %1969 = vmatpush3.msra.mxu0 %v1104_v30 }
 0x350   :  { %1945 = vmatpush3.msra.mxu1 %v979_v2  ;;  %1970 = vmatprep.subr.mxu0 %v1103_v31  ;;  %v1357_v2 = vld [vmem:[#allocation8 + $0x70] sm:$0xff] }
 0x351   :  { %1946 = vmatprep.subr.mxu1 %v978_v8  ;;  %1971 = vmatpush3.msra.mxu0 %v1103_v31 }
 0x352   :  { %1947 = vmatpush3.msra.mxu1 %v978_v8  ;;  %1972 = vmatprep.subr.mxu0 %v1102_v7  ;;  %v1356_v8 = vld [vmem:[#allocation8 + $0x68] sm:$0xff] }
 0x353   :  { %1948 = vmatprep.subr.mxu1 %v977_v17  ;;  %1973 = vmatpush3.msra.mxu0 %v1102_v7 }
 0x354   :  { %1949 = vmatpush3.msra.mxu1 %v977_v17  ;;  %1974 = vmatprep.subr.mxu0 %v1101_v23  ;;  %v1355_v17 = vld [vmem:[#allocation8 + $0x60] sm:$0xff] }
 0x355   :  { %1950 = vmatprep.subr.mxu1 %v976_v15  ;;  %1975 = vmatpush3.msra.mxu0 %v1101_v23 }
 0x356   :  { %1951 = vmatpush3.msra.mxu1 %v976_v15  ;;  %1976 = vmatprep.subr.mxu0 %v1100_v22  ;;  %v1354_v15 = vld [vmem:[#allocation8 + $0x58] sm:$0xff] }
 0x357   :  { %1952 = vmatprep.subr.mxu1 %v975_v18  ;;  %1977 = vmatpush3.msra.mxu0 %v1100_v22 }
 0x358   :  { %1953 = vmatpush3.msra.mxu1 %v975_v18  ;;  %1978 = vmatprep.subr.mxu0 %v1099_v32  ;;  %v1350_v18 = vld [vmem:[#allocation8 + $0x38] sm:$0xff] }
 0x359   :  { %1954 = vmatprep.subr.mxu1 %v974_v19  ;;  %1979 = vmatpush3.msra.mxu0 %v1099_v32 }
 0x35a   :  { %1955 = vmatpush3.msra.mxu1 %v974_v19  ;;  %v1349_v19 = vld [vmem:[#allocation8 + $0x30] sm:$0xff] }
 0x35b   :  { %1956 = vmatprep.subr.mxu1 %v973_v14 }
 0x35c   :  { %1957 = vmatpush3.msra.mxu1 %v973_v14  ;;  %v1348_v14 = vld [vmem:[#allocation8 + $0x28] sm:$0xff] }
 0x35d   :  { %1958 = vmatprep.subr.mxu1 %v972_v20 }
 0x35e   :  { %1959 = vmatpush3.msra.mxu1 %v972_v20  ;;  %v1347_v20 = vld [vmem:[#allocation8 + $0x20] sm:$0xff] }
 0x35f   :  { %1961 = vmatmul.mubr.f32.vlgmr.msra.gmra.mxu1 %v764_v25  ;;  %v1344_v25 = vld [vmem:[#allocation8 + $0x8] sm:$0xff] }
 0x360   :  { %1963 = vmatprep.mubr.f32.mxu1 %v765_v26  ;;  %v1343_v26 = vld [vmem:[#allocation8] sm:$0xff] }
 0x363   :  { %1964 = vmatmul.mubr.f32.gmra.mxu1 %v766_v28  ;;  %v1482_v28 = vld [vmem:[%s2413_s7 + $0x1] ss:$0 sm:$0xff] }
 0x364   :  { %2012 = vmatprep.mubr.msk.f32.mxu1 %vm592_vm0, %v2325_v63  ;;  %v1098_v63 = vld [vmem:[#allocation6 + $0xc0] sm:$0xff] }
 0x365   :  { %1980 = vmatprep.subr.mxu0 %v1098_v63 }
 0x366   :  { %1981 = vmatpush3.msra.mxu0 %v1098_v63 }
 0x367   :  { %1982 = vmatprep.subr.mxu0 %v1097_v33 }
 0x368   :  { %1983 = vmatpush3.msra.mxu0 %v1097_v33 }
 0x369   :  { %1984 = vmatprep.subr.mxu0 %v1096_v34 }
 0x36a   :  { %1985 = vmatpush3.msra.mxu0 %v1096_v34 }
 0x36b   :  { %1986 = vmatprep.subr.mxu0 %v1095_v36 }
 0x36c   :  { %1987 = vmatpush3.msra.mxu0 %v1095_v36 }
 0x36d   :  { %1988 = vmatprep.subr.mxu0 %v1094_v37 }
 0x36e   :  { %1989 = vmatpush3.msra.mxu0 %v1094_v37 }
 0x36f   :  { %1990 = vmatprep.subr.mxu0 %v1093_v38 }
 0x370   :  { %1991 = vmatpush3.msra.mxu0 %v1093_v38 }
 0x371   :  { %1992 = vmatprep.subr.mxu0 %v1092_v39 }
 0x372   :  { %1993 = vmatpush3.msra.mxu0 %v1092_v39 }
 0x373   :  { %1994 = vmatprep.subr.mxu0 %v1091_v40 }
 0x374   :  { %1995 = vmatpush3.msra.mxu0 %v1091_v40 }
 0x375   :  { %1996 = vmatprep.subr.mxu0 %v1090_v41 }
 0x376   :  { %1997 = vmatpush3.msra.mxu0 %v1090_v41 }
 0x377   :  { %2018 = vmatprep.subr.mxu0 %v1358_v1 }
 0x3ff   :  { %v1886_v43 = vpop.f32.mrf.mxu1 }
 0x401   :  { %v867_v44 = vpop.f32.mrf.mxu1 }
 0x403   :  { %v1889_v46 = vpop.f32.mrf.mxu1 }
 0x405   :  { %v877_v48 = vpop.f32.mrf.mxu1 }
 0x40a   :  { %v1924_v45 = vpop.f32.mrf.mxu0 }
 0x40b   :  { %v958_v50 = vadd.f32 %v1924_v45, %v1886_v43 }
 0x40c   :  { %v952_v47 = vpop.f32.mrf.mxu0 }
 0x40d   :  { %v953_v54 = vadd.f32 %v952_v47, %v867_v44 }
 0x40e   :  { %v1927_v49 = vpop.f32.mrf.mxu0 }
 0x40f   :  { %v968_v52 = vadd.f32 %v1927_v49, %v1889_v46 }
 0x410   :  { %v962_v55 = vpop.f32.mrf.mxu0 }
 0x411   :  { %v963_v59 = vadd.f32 %v962_v55, %v877_v48 }
 0x41f   :  { %v1962_v53 = vpop.f32.mrf.mxu1 }
 0x420   :  { %v1074_v56 = vadd.f32 %v1962_v53, %v958_v50 }
 0x421   :  { %v1054_v57 = vpop.f32.mrf.mxu1 }
 0x422   :  { %v1073_v51 = vadd.f32 %v1054_v57, %v953_v54  ;;  %v1086_v62 = vadd.f32 %v1480_v60, %v1074_v56 }
 0x423   :  { %v1965_v58 = vpop.f32.mrf.mxu1 }
 0x424   :  { %v1085_v61 = vadd.f32 %v1480_v60, %v1073_v51  ;;  %v1076_v0 = vadd.f32 %v1965_v58, %v968_v52 }
 0x425   :  { %v1064_v3 = vpop.f32.mrf.mxu1 }
 0x426   :  { %v1075_v4 = vadd.f32 %v1064_v3, %v963_v59  ;;  %1998 = vmatprep.mubr.f32.mxu0 %v1085_v61  ;;  %v1088_v5 = vadd.f32 %v1480_v60, %v1076_v0  ;;  %v1487_v61 = vld [vmem:[%s2414_s8 + $0x1] sm:$0x1] }
 0x427   :  { %1999 = vmatmul.mubr.f32.vlgmr.msra.gmra.mxu0 %v1086_v62  ;;  %v1488_v3 = vld [vmem:[%s2415_s9 + $0x1] sm:$0x1] }
 0x428   :  { %v1087_v42 = vadd.f32 %v1480_v60, %v1075_v4  ;;  %2019 = vmatpush3.msra.mxu0 %v1358_v1 }
 0x429   :  { %2020 = vmatprep.subr.mxu0 %v1357_v2 }
 0x42a   :  { %2001 = vmatprep.mubr.f32.mxu0 %v1087_v42  ;;  %2021 = vmatpush3.msra.mxu0 %v1357_v2 }
 0x42b   :  { %2002 = vmatmul.mubr.f32.gmra.mxu0 %v1088_v5  ;;  %2022 = vmatprep.subr.mxu0 %v1356_v8 }
 0x42c   :  { %2023 = vmatpush3.msra.mxu0 %v1356_v8 }
 0x42d   :  { %2024 = vmatprep.subr.mxu0 %v1355_v17 }
 0x42e   :  { %2025 = vmatpush3.msra.mxu0 %v1355_v17 }
 0x42f   :  { %2026 = vmatprep.subr.mxu0 %v1354_v15 }
 0x430   :  { %2027 = vmatpush3.msra.mxu0 %v1354_v15 }
 0x4e7   :  { %v2000_v11 = vpop.f32.mrf.mxu0 }
 0x4e9   :  { %v1172_v12 = vpop.f32.mrf.mxu0 }
 0x4eb   :  { %v2003_v13 = vpop.f32.mrf.mxu0 }
 0x4ec   :  { %2004 = vmatprep.subr.mxu1 %v2003_v13 }
 0x4ed   :  { %v1182_v16 = vpop.f32.mrf.mxu0  ;;  %2005 = vmatpush3.msra.mxu1 %v2003_v13 }
 0x4ee   :  { %2006 = vmatprep.subr.mxu1 %v1182_v16 }
 0x4ef   :  { %2007 = vmatpush3.msra.mxu1 %v1182_v16 }
 0x4f0   :  { %2008 = vmatprep.subr.mxu1 %v2000_v11 }
 0x4f1   :  { %2009 = vmatpush3.msra.mxu1 %v2000_v11 }
 0x4f2   :  { %2010 = vmatprep.subr.mxu1 %v1172_v12 }
 0x4f3   :  { %2011 = vmatpush3.msra.mxu1 %v1172_v12 }
 0x4f4   :  { %2013 = vmatmul.mubr.msk.f32.vlgmr.msra.gmra.mxu1 %vm592_vm0, %v2332_v6  ;;  %v1353_v6 = vld [vmem:[#allocation8 + $0x50] sm:$0xff] }
 0x4f5   :  { %2015 = vmatprep.mubr.msk.f32.mxu1 %vm592_vm0, %v2337_v9  ;;  %2028 = vmatprep.subr.mxu0 %v1353_v6  ;;  %v1352_v9 = vld [vmem:[#allocation8 + $0x48] sm:$0xff] }
 0x4f6   :  { %2029 = vmatpush3.msra.mxu0 %v1353_v6 }
 0x4f7   :  { %2030 = vmatprep.subr.mxu0 %v1352_v9 }
 0x4f8   :  { %2016 = vmatmul.mubr.msk.f32.gmra.mxu1 %vm592_vm0, %v2346_v10  ;;  %2031 = vmatpush3.msra.mxu0 %v1352_v9  ;;  %v1351_v10 = vld [vmem:[#allocation8 + $0x40] sm:$0xff] }
 0x4f9   :  { %2032 = vmatprep.subr.mxu0 %v1351_v10 }
 0x4fa   :  { %2033 = vmatpush3.msra.mxu0 %v1351_v10 }
 0x4fb   :  { %2034 = vmatprep.subr.mxu0 %v1350_v18 }
 0x4fc   :  { %2035 = vmatpush3.msra.mxu0 %v1350_v18 }
 0x4fd   :  { %2036 = vmatprep.subr.mxu0 %v1349_v19 }
 0x4fe   :  { %2037 = vmatpush3.msra.mxu0 %v1349_v19  ;;  %v1489_v19 = vld [vmem:[%s2417_s11] ss:$0 sm:$0xff] }
 0x4ff   :  { %2038 = vmatprep.subr.mxu0 %v1348_v14 }
 0x500   :  { %2039 = vmatpush3.msra.mxu0 %v1348_v14 }
 0x501   :  { %2040 = vmatprep.subr.mxu0 %v1347_v20 }
 0x502   :  { %2041 = vmatpush3.msra.mxu0 %v1347_v20 }
 0x503   :  { %2042 = vmatprep.subr.mxu0 %v1346_v21 }
 0x504   :  { %2043 = vmatpush3.msra.mxu0 %v1346_v21 }
 0x505   :  { %2044 = vmatprep.subr.mxu0 %v1345_v24 }
 0x506   :  { %2045 = vmatpush3.msra.mxu0 %v1345_v24 }
 0x507   :  { %2046 = vmatprep.subr.mxu0 %v1344_v25 }
 0x508   :  { %2047 = vmatpush3.msra.mxu0 %v1344_v25 }
 0x509   :  { %2048 = vmatprep.subr.mxu0 %v1343_v26 }
 0x50a   :  { %2049 = vmatpush3.msra.mxu0 %v1343_v26 }
 0x5b4   :  { %v2014_v27 = vpop.f32.mrf.mxu1 }
 0x5b5   :  { %v1271_v30 = vadd.f32 %v2014_v27, %v1482_v28 }
 0x5b6   :  { %v1265_v29 = vpop.f32.mrf.mxu1 }
 0x5b7   :  { %v1266_v31 = vadd.f32 %v1482_v28, %v1265_v29  ;;  %v1295_v32 = vmul.f32 %v1271_v30, %v1271_v30 }
 0x5b8   :  { %v2017_v7 = vpop.f32.mrf.mxu1 }
 0x5b9   :  { %v1294_v23 = vmul.f32 %v1266_v31, %v1266_v31  ;;  %v1284_v63 = vadd.f32 %v1271_v30, %v1266_v31  ;;  %v1281_v33 = vadd.f32 %v2017_v7, %v1482_v28 }
 0x5ba   :  { %v1275_v22 = vpop.f32.mrf.mxu1 }
 0x5bb   :  { %v1276_v34 = vadd.f32 %v1482_v28, %v1275_v22  ;;  %v1298_v36 = vadd.f32 %v1295_v32, %v1294_v23  ;;  %v1297_v39 = vmul.f32 %v1281_v33, %v1281_v33 }
 0x5bd   :  { %v1285_v37 = vadd.f32 %v1284_v63, %v1276_v34  ;;  %v1296_v38 = vmul.f32 %v1276_v34, %v1276_v34 }
 0x5bf   :  { %v1286_v40 = vadd.f32 %v1285_v37, %v1281_v33  ;;  %v1299_v41 = vadd.f32 %v1298_v36, %v1296_v38 }
 0x5c1   :  { %v1287_v43 = vrot.slane %v1286_v40, 4  ;;  %v1300_v44 = vadd.f32 %v1299_v41, %v1297_v39 }
 0x5c3   :  { %v1288_v45 = vadd.f32 %v1287_v43, %v1286_v40  ;;  %v1301_v46 = vrot.slane %v1300_v44, 4 }
 0x5c5   :  { %v1289_v47 = vrot.slane %v1288_v45, 2  ;;  %v1302_v48 = vadd.f32 %v1301_v46, %v1300_v44 }
 0x5c7   :  { %v1290_v49 = vadd.f32 %v1289_v47, %v1288_v45  ;;  %v1303_v50 = vrot.slane %v1302_v48, 2 }
 0x5c9   :  { %v1291_v53 = vrot.slane %v1290_v49, 1  ;;  %v1304_v54 = vadd.f32 %v1303_v50, %v1302_v48 }
 0x5cb   :  { %v1292_v55 = vadd.f32 %v1291_v53, %v1290_v49  ;;  %v1305_v56 = vrot.slane %v1304_v54, 1 }
 0x5cd   :  { %v1293_v57 = vmul.f32 0.03125, %v1292_v55  ;;  %v1306_v60 = vadd.f32 %v1305_v56, %v1304_v54 }
 0x5cf   :  { %v1307_v51 = vmul.f32 0.03125, %v1306_v60  ;;  %v1308_v52 = vmul.f32 %v1293_v57, %v1293_v57 }
 0x5d1   :  { %v1309_v58 = vsub.f32 %v1307_v51, %v1308_v52 }
 0x5d3   :  { %v1310_v59 = vadd.f32 1e-05, %v1309_v58 }
 0x5d5   :  { %2068 = vrsqrt.f32 %v1310_v59 }
 0x5e2   :  { %v2069_v62 = vpop.eup %2068 }
 0x5e3   :  { %v1314_v0 = vmul.f32 %v2069_v62, %v1487_v61 }
 0x5e5   :  { %v1317_v4 = vmul.f32 %v1314_v0, %v1293_v57  ;;  %v1323_v42 = vrot.slane %v1314_v0, %v2359_v35 }
 0x5e7   :  { %v1318_v5 = vsub.f32 %v1488_v3, %v1317_v4  ;;  %v1327_v11 = vmul.f32 %v1323_v42, %v1276_v34  ;;  %v1325_v12 = vmul.f32 %v1323_v42, %v1266_v31  ;;  %v1326_v16 = vmul.f32 %v1323_v42, %v1271_v30 }
 0x5e8   :  { %v1328_v17 = vmul.f32 %v1323_v42, %v1281_v33 }
 0x5e9   :  { %v1333_v13 = vrot.slane %v1318_v5, %v2359_v35 }
 0x5eb   :  { %v1335_v1 = vadd.f32 %v1333_v13, %v1325_v12  ;;  %v1336_v2 = vadd.f32 %v1333_v13, %v1326_v16  ;;  %v1337_v8 = vadd.f32 %v1333_v13, %v1327_v11  ;;  %v1338_v9 = vadd.f32 %v1333_v13, %v1328_v17 }
 0x5ed   :  { %v1339_v15 = vmax.f32 %v1335_v1, 0.0  ;;  %v1340_v6 = vmax.f32 %v1336_v2, 0.0  ;;  %v1341_v10 = vmax.f32 %v1337_v8, 0.0  ;;  %v1342_v18 = vmax.f32 %v1338_v9, 0.0 }
 0x5ef   :  { %2050 = vmatprep.mubr.f32.mxu0 %v1339_v15 }
 0x5f0   :  { %2051 = vmatmul.mubr.f32.vlgmr.msra.gmra.mxu0 %v1340_v6 }
 0x5f1   :  { %2053 = vmatprep.mubr.f32.mxu0 %v1341_v10 }
 0x5f4   :  { %2054 = vmatmul.mubr.f32.gmra.mxu0 %v1342_v18 }
 0x6b0   :  { %v2052_v14 = vpop.f32.mrf.mxu0 }
 0x6b1   :  { %v1438_v35 = vadd.f32 %v2052_v14, %v1489_v19 }
 0x6b2   :  { %v1432_v20 = vpop.f32.mrf.mxu0 }
 0x6b3   :  { %1452 = vst [vmem:[#allocation9 + $0x8] sm:$0xff] %v1438_v35  ;;  %v1433_v21 = vadd.f32 %v1489_v19, %v1432_v20 }
 0x6b4   :  { %v2055_v24 = vpop.f32.mrf.mxu0 }
 0x6b5   :  { %1451 = vst [vmem:[#allocation9] sm:$0xff] %v1433_v21  ;;  %v1448_v25 = vadd.f32 %v2055_v24, %v1489_v19 }
 0x6b6   :  { %v1442_v26 = vpop.f32.mrf.mxu0 }
 0x6b7   :  { %1454 = vst [vmem:[#allocation9 + $0x18] sm:$0xff] %v1448_v25  ;;  %v1443_v27 = vadd.f32 %v1489_v19, %v1442_v26 }
 0x6b9   :  { %1453 = vst [vmem:[#allocation9 + $0x10] sm:$0xff] %v1443_v27 }
 0x6ba   :  { %2141 = shalt.err (!%p2138_p5)
}
 0x6bb   :  { %1466 = dma.vmem_to_hbm [thread:$0]  %s1461_s0, 512, %s2418_s12, [#allocation5], %s2158_s26, %s2158_s26, %s2159_s27  }
 0x6bc   :  { %2154 = dma.done.wait [#allocation5], 512  }
 0x6bd   :  { %2155 = vsyncadd [#allocation5], 4294966784 }
 0x6be   :  { %1470 = vsyncpa [#allocation4], 1 }
 0x6bf   :  { %1471 = vsyncpa [#allocation7], 1 }
 0x6c0   :  { %1472 = vsyncpa [#allocation5], 1 }

</bundles_post_ra>
